<compile_context>
chip_gen: v7x
topology: tpu7x:2x2x1
jax: 0.10.0
libtpu: 0.0.40
codegen_flags: <defaults>
</compile_context>

<pallas_src>
import functools
import math

import jax
import jax.numpy as jnp
from jax.experimental import pallas as pl
from jax.experimental.pallas import tpu as pltpu


# ---------------------------------------------------------------------------
# Kernel bodies
# ---------------------------------------------------------------------------

def _attention_and_out(num_heads, Qb, Kb, Vb, wo_ref, bo_ref, o_ref, ctx_ref):
    """Head-batched scaled-dot-product attention + output projection.

    Qb/Kb/Vb: (Bt*S, E) bf16 (Q already carries the 1/sqrt(Dh) scale).
    ctx_ref:  (Bt*S, E) bf16 VMEM scratch.
    """
    Bt, S, E = o_ref.shape
    H = num_heads
    Dh = E // H

    for b in range(Bt):
        r0 = b * S
        q_rows = Qb[r0:r0 + S, :]          # (S, E) lane-dense row slices
        k_rows = Kb[r0:r0 + S, :]
        v_rows = Vb[r0:r0 + S, :]

        # Split heads into a leading batch dim: (H, S, Dh).
        qh = jnp.stack([q_rows[:, h * Dh:(h + 1) * Dh] for h in range(H)], axis=0)
        kh = jnp.stack([k_rows[:, h * Dh:(h + 1) * Dh] for h in range(H)], axis=0)
        vh = jnp.stack([v_rows[:, h * Dh:(h + 1) * Dh] for h in range(H)], axis=0)

        # One batched MXU pass for all heads' scores; softmax in f32.
        s = jnp.einsum('hqd,hkd->hqk', qh, kh,
                       preferred_element_type=jnp.float32)
        m = jnp.max(s, axis=-1, keepdims=True)
        e = jnp.exp(s - m)
        denom = jnp.sum(e, axis=-1, keepdims=True)
        p = (e * pl.reciprocal(denom, approx=True)).astype(jnp.bfloat16)

        # One batched MXU pass for all heads' context.
        ctx = jnp.einsum('hqk,hkd->hqd', p, vh,
                         preferred_element_type=jnp.float32).astype(jnp.bfloat16)

        # Reassemble heads along lanes and do ONE lane-dense row store.
        ctx_rows = jnp.concatenate([ctx[h] for h in range(H)], axis=-1)  # (S, E)
        ctx_ref[r0:r0 + S, :] = ctx_rows

    # Output projection over the whole (Bt*S, E) context block.
    out = jnp.dot(ctx_ref[...], wo_ref[...],
                  preferred_element_type=jnp.float32) + bo_ref[...]
    o_ref[...] = out.reshape(Bt, S, E).astype(o_ref.dtype)


def _mha_kernel(num_heads,
                q_ref, k_ref, v_ref,
                wq_ref, bq_ref, wk_ref, bk_ref, wv_ref, bv_ref,
                wo_ref, bo_ref,
                o_ref, ctx_ref):
    """General path: separate query/key/value tensors and projections."""
    Bt, S, E = q_ref.shape
    q_in = q_ref[...].reshape(Bt * S, E).astype(jnp.bfloat16)
    k_in = k_ref[...].reshape(Bt * S, E).astype(jnp.bfloat16)
    v_in = v_ref[...].reshape(Bt * S, E).astype(jnp.bfloat16)

    # bf16 x bf16 -> f32 accumulate; cast straight back to bf16 so the f32
    # intermediates die immediately (wq/bq already carry the 1/sqrt(Dh) scale).
    Qb = (jnp.dot(q_in, wq_ref[...], preferred_element_type=jnp.float32)
          + bq_ref[...]).astype(jnp.bfloat16)
    Kb = (jnp.dot(k_in, wk_ref[...], preferred_element_type=jnp.float32)
          + bk_ref[...]).astype(jnp.bfloat16)
    Vb = (jnp.dot(v_in, wv_ref[...], preferred_element_type=jnp.float32)
          + bv_ref[...]).astype(jnp.bfloat16)

    _attention_and_out(num_heads, Qb, Kb, Vb, wo_ref, bo_ref, o_ref, ctx_ref)


def _mha_self_kernel(num_heads,
                     x_ref, wqkv_ref, bqkv_ref, wo_ref, bo_ref,
                     o_ref, ctx_ref):
    """Self-attention path: fused (E, 3E) QKV projection, single input load."""
    Bt, S, E = x_ref.shape
    x = x_ref[...].reshape(Bt * S, E).astype(jnp.bfloat16)
    qkv = (jnp.dot(x, wqkv_ref[...], preferred_element_type=jnp.float32)
           + bqkv_ref[...]).astype(jnp.bfloat16)
    Qb = qkv[:, 0:E]
    Kb = qkv[:, E:2 * E]
    Vb = qkv[:, 2 * E:3 * E]
    _attention_and_out(num_heads, Qb, Kb, Vb, wo_ref, bo_ref, o_ref, ctx_ref)


# ---------------------------------------------------------------------------
# Wrapper / tiling heuristics
# ---------------------------------------------------------------------------

def _vmem_limit_bytes():
    """Generation-aware scoped-VMEM limit (~54 MiB on v7x, 100 MiB v5e/v6e)."""
    cap = 128 * 1024 * 1024
    try:
        info = pltpu.get_tpu_info()
        cap = int(getattr(info, "vmem_capacity_bytes", cap))
    except Exception:
        pass
    return max(32 * 1024 * 1024, min(int(cap * 0.85), 100 * 1024 * 1024))


def _largest_divisor_at_most(n, k):
    k = max(1, min(n, k))
    while n % k:
        k -= 1
    return k


def _pick_batch_block(batch, seq, embed, num_heads, vmem_limit, rows_target=512):
    """Batch elements per grid step: big blocks (amortize per-step overhead,
    feed the MXU with large M) bounded by a rough VMEM footprint estimate."""
    if batch <= 1:
        return 1

    bt = _largest_divisor_at_most(batch, max(1, rows_target // max(seq, 1)))

    # Keep >= 2 grid steps (both v7x TensorCores) only when splitting still
    # leaves >= 256 matmul rows per step; otherwise one big block (v5e/v6e
    # are single-TC so extra grid steps are pure overhead).
    if bt == batch and (batch // 2) * seq >= 256:
        bt = _largest_divisor_at_most(batch, batch // 2)

    def footprint(bt_):
        rows = bt_ * seq
        io_blk = 4 * 2 * rows * embed * 4                 # q,k,v,out blocks, dbl-buffered f32
        ctx = rows * embed * 2                            # bf16 ctx scratch
        wts = 2 * (4 * embed * embed + 8 * embed) * 2     # weights/biases (worst case)
        live = 3 * rows * embed * 2                       # live bf16 Q/K/V
        scores = 2 * num_heads * seq * seq * 4            # live f32 score slab
        return io_blk + ctx + wts + live + scores

    while bt > 1 and footprint(bt) > int(0.7 * vmem_limit):
        bt = _largest_divisor_at_most(batch, bt - 1)
    return bt


def prepare_mha_params(params, num_heads):
    """One-time weight prep: transpose to x@W form, fold 1/sqrt(Dh) into the Q
    projection, cast to bf16, and build the fused (E, 3E) QKV weights.
    Call once per parameter set (outside the per-step hot path)."""
    E = params["wq"].shape[0]
    Dh = E // num_heads
    scale = 1.0 / math.sqrt(Dh)
    cdt = jnp.bfloat16

    wq = (params["wq"].T * scale).astype(cdt)
    wk = params["wk"].T.astype(cdt)
    wv = params["wv"].T.astype(cdt)
    wo = params["wo"].T.astype(cdt)
    bq = (params["bq"] * scale).reshape(1, E).astype(jnp.float32)
    bk = params["bk"].reshape(1, E).astype(jnp.float32)
    bv = params["bv"].reshape(1, E).astype(jnp.float32)
    bo = params["bo"].reshape(1, E).astype(jnp.float32)

    return {
        "wq": wq, "bq": bq, "wk": wk, "bk": bk, "wv": wv, "bv": bv,
        "wo": wo, "bo": bo,
        "wqkv": jnp.concatenate([wq, wk, wv], axis=1),   # (E, 3E)
        "bqkv": jnp.concatenate([bq, bk, bv], axis=1),   # (1, 3E)
        "embed": E,
    }


def multihead_attention(query, key, value, prep, num_heads, *, self_attention=None):
    """query/key/value: (B, S, E) f32.  prep: output of prepare_mha_params."""
    B, S, E = query.shape
    assert E % num_heads == 0, "embed_size must be divisible by num_heads"

    if self_attention is None:
        self_attention = (query is key) and (key is value)

    vmem_limit = _vmem_limit_bytes()
    Bt = _pick_batch_block(B, S, E, num_heads, vmem_limit)
    grid = (B // Bt,)

    seq_spec = pl.BlockSpec((Bt, S, E), lambda b: (b, 0, 0))

    # Grid-invariant weight/bias blocks: single-buffer them once E is large
    # enough that double-buffered (E, E) bf16 tiles matter for VMEM (v7x).
    pmode = pl.Buffered(1) if E >= 512 else None

    def const_spec(shape):
        index_map = lambda b: (0,) * len(shape)
        if pmode is None:
            return pl.BlockSpec(shape, index_map)
        return pl.BlockSpec(shape, index_map, pipeline_mode=pmode)

    cparams = pltpu.CompilerParams(
        dimension_semantics=("parallel",),
        vmem_limit_bytes=vmem_limit)
    out_shape = jax.ShapeDtypeStruct((B, S, E), query.dtype)
    scratch = [pltpu.VMEM((Bt * S, E), jnp.bfloat16)]

    if self_attention:
        kernel = functools.partial(_mha_self_kernel, num_heads)
        return pl.pallas_call(
            kernel,
            out_shape=out_shape,
            grid=grid,
            in_specs=[seq_spec,
                      const_spec((E, 3 * E)), const_spec((1, 3 * E)),
                      const_spec((E, E)), const_spec((1, E))],
            out_specs=seq_spec,
            scratch_shapes=scratch,
            compiler_params=cparams,
        )(query, prep["wqkv"], prep["bqkv"], prep["wo"], prep["bo"])

    kernel = functools.partial(_mha_kernel, num_heads)
    return pl.pallas_call(
        kernel,
        out_shape=out_shape,
        grid=grid,
        in_specs=[seq_spec, seq_spec, seq_spec,
                  const_spec((E, E)), const_spec((1, E)),
                  const_spec((E, E)), const_spec((1, E)),
                  const_spec((E, E)), const_spec((1, E)),
                  const_spec((E, E)), const_spec((1, E))],
        out_specs=seq_spec,
        scratch_shapes=scratch,
        compiler_params=cparams,
    )(query, key, value,
      prep["wq"], prep["bq"], prep["wk"], prep["bk"],
      prep["wv"], prep["bv"], prep["wo"], prep["bo"])


# ---------------------------------------------------------------------------
# Pure-JAX reference (mirrors the PyTorch forward)
# ---------------------------------------------------------------------------

def _reference(query, key, value, params, num_heads):
    B, S, E = query.shape
    H = num_heads
    Dh = E // H

    def lin(x, w, b):
        return x @ w.T + b

    Q = lin(query, params["wq"], params["bq"]).reshape(B, S, H, Dh).transpose(0, 2, 1, 3)
    K = lin(key, params["wk"], params["bk"]).reshape(B, S, H, Dh).transpose(0, 2, 1, 3)
    V = lin(value, params["wv"], params["bv"]).reshape(B, S, H, Dh).transpose(0, 2, 1, 3)

    scores = jnp.einsum('bhqd,bhkd->bhqk', Q, K) / jnp.sqrt(jnp.float32(Dh))
    attn = jax.nn.softmax(scores, axis=-1)
    ctx = jnp.einsum('bhqk,bhkd->bhqd', attn, V)
    ctx = ctx.transpose(0, 2, 1, 3).reshape(B, S, E)
    return lin(ctx, params["wo"], params["bo"])


if __name__ == "__main__":
    B, S, E, H = 2, 8, 32, 4

    key0 = jax.random.PRNGKey(0)
    keys = jax.random.split(key0, 11)
    bound = 1.0 / math.sqrt(E)

    def init_w(k):
        return jax.random.uniform(k, (E, E), jnp.float32, -bound, bound)

    def init_b(k):
        return jax.random.uniform(k, (E,), jnp.float32, -bound, bound)

    params = {
        "wq": init_w(keys[0]), "bq": init_b(keys[1]),
        "wk": init_w(keys[2]), "bk": init_b(keys[3]),
        "wv": init_w(keys[4]), "bv": init_b(keys[5]),
        "wo": init_w(keys[6]), "bo": init_b(keys[7]),
    }

    query = jax.random.normal(keys[8], (B, S, E), jnp.float32)
    key_in = jax.random.normal(keys[9], (B, S, E), jnp.float32)
    value = jax.random.normal(keys[10], (B, S, E), jnp.float32)

    prep = prepare_mha_params(params, H)   # hoisted weight prep (done once)

    # Cross-attention path (separate q/k/v projections).
    out = multihead_attention(query, key_in, value, prep, H)
    out = jax.block_until_ready(out)
    ref = _reference(query, key_in, value, params, H)
    assert out.shape == (B, S, E)
    # bf16 MXU matmuls (f32 accumulate) + approx reciprocal loosen the
    # tolerance vs. the pure-f32 reference.
    assert jnp.allclose(out, ref, atol=5e-2, rtol=5e-2), "cross-attn mismatch"

    # Self-attention path (fused (E, 3E) QKV projection).
    out_self = multihead_attention(query, query, query, prep, H, self_attention=True)
    out_self = jax.block_until_ready(out_self)
    ref_self = _reference(query, query, query, params, H)
    assert jnp.allclose(out_self, ref_self, atol=5e-2, rtol=5e-2), "self-attn mismatch"

    print("KERNEL_OK")
</pallas_src>

<mosaic_0001>
module attributes {stable_mosaic.version = 11 : i64} {
  func.func @_mha_kernel(%arg0: i32, %arg1: memref<2x8x32xf32, #tpu.memory_space<vmem>>, %arg2: memref<2x8x32xf32, #tpu.memory_space<vmem>>, %arg3: memref<2x8x32xf32, #tpu.memory_space<vmem>>, %arg4: memref<32x32xbf16, #tpu.memory_space<vmem>>, %arg5: memref<1x32xf32, #tpu.memory_space<vmem>>, %arg6: memref<32x32xbf16, #tpu.memory_space<vmem>>, %arg7: memref<1x32xf32, #tpu.memory_space<vmem>>, %arg8: memref<32x32xbf16, #tpu.memory_space<vmem>>, %arg9: memref<1x32xf32, #tpu.memory_space<vmem>>, %arg10: memref<32x32xbf16, #tpu.memory_space<vmem>>, %arg11: memref<1x32xf32, #tpu.memory_space<vmem>>, %arg12: memref<2x8x32xf32, #tpu.memory_space<vmem>>, %arg13: memref<16x32xbf16, #tpu.memory_space<vmem>>) attributes {dimension_semantics = [#tpu.dimension_semantics<parallel>], iteration_bounds = array<i64: 1>, scalar_prefetch = 0 : i64, scratch_operands = 1 : i64, tpu.core_type = #tpu.core_type<tc>, window_params = [{transform_indices = @transform_0, window_bounds = array<i64: 2, 8, 32>}, {transform_indices = @transform_1, window_bounds = array<i64: 2, 8, 32>}, {transform_indices = @transform_2, window_bounds = array<i64: 2, 8, 32>}, {pipeline_mode = #tpu.pipeline_mode<synchronous>, transform_indices = @transform_3, window_bounds = array<i64: 32, 32>}, {pipeline_mode = #tpu.pipeline_mode<synchronous>, transform_indices = @transform_4, window_bounds = array<i64: 1, 32>}, {pipeline_mode = #tpu.pipeline_mode<synchronous>, transform_indices = @transform_5, window_bounds = array<i64: 32, 32>}, {pipeline_mode = #tpu.pipeline_mode<synchronous>, transform_indices = @transform_6, window_bounds = array<i64: 1, 32>}, {pipeline_mode = #tpu.pipeline_mode<synchronous>, transform_indices = @transform_7, window_bounds = array<i64: 32, 32>}, {pipeline_mode = #tpu.pipeline_mode<synchronous>, transform_indices = @transform_8, window_bounds = array<i64: 1, 32>}, {pipeline_mode = #tpu.pipeline_mode<synchronous>, transform_indices = @transform_9, window_bounds = array<i64: 32, 32>}, {pipeline_mode = #tpu.pipeline_mode<synchronous>, transform_indices = @transform_10, window_bounds = array<i64: 1, 32>}, {transform_indices = @transform_11, window_bounds = array<i64: 2, 8, 32>}]} {
    %c0 = arith.constant 0 : index
    %c0_0 = arith.constant 0 : index
    %c0_1 = arith.constant 0 : index
    %0 = vector.load %arg1[%c0, %c0_0, %c0_1] : memref<2x8x32xf32, #tpu.memory_space<vmem>>, vector<2x8x32xf32>
    %1 = vector.shape_cast %0 : vector<2x8x32xf32> to vector<16x32xf32>
    %2 = arith.truncf %1 : vector<16x32xf32> to vector<16x32xbf16>
    %c0_2 = arith.constant 0 : index
    %c0_3 = arith.constant 0 : index
    %c0_4 = arith.constant 0 : index
    %3 = vector.load %arg2[%c0_2, %c0_3, %c0_4] : memref<2x8x32xf32, #tpu.memory_space<vmem>>, vector<2x8x32xf32>
    %4 = vector.shape_cast %3 : vector<2x8x32xf32> to vector<16x32xf32>
    %5 = arith.truncf %4 : vector<16x32xf32> to vector<16x32xbf16>
    %c0_5 = arith.constant 0 : index
    %c0_6 = arith.constant 0 : index
    %c0_7 = arith.constant 0 : index
    %6 = vector.load %arg3[%c0_5, %c0_6, %c0_7] : memref<2x8x32xf32, #tpu.memory_space<vmem>>, vector<2x8x32xf32>
    %7 = vector.shape_cast %6 : vector<2x8x32xf32> to vector<16x32xf32>
    %8 = arith.truncf %7 : vector<16x32xf32> to vector<16x32xbf16>
    %c0_8 = arith.constant 0 : index
    %c0_9 = arith.constant 0 : index
    %9 = vector.load %arg4[%c0_8, %c0_9] : memref<32x32xbf16, #tpu.memory_space<vmem>>, vector<32x32xbf16>
    %cst = arith.constant dense<0.000000e+00> : vector<16x32xf32>
    %10 = tpu.matmul %2, %9, %cst {dimension_numbers = #tpu.dot_dimension_numbers<[1], [0], [0], [1], [0, 0, 1, 1], [], []>} : vector<16x32xbf16>, vector<32x32xbf16>, vector<16x32xf32> -> vector<16x32xf32>
    %c0_10 = arith.constant 0 : index
    %c0_11 = arith.constant 0 : index
    %11 = vector.load %arg5[%c0_10, %c0_11] : memref<1x32xf32, #tpu.memory_space<vmem>>, vector<1x32xf32>
    %12 = vector.broadcast %11 : vector<1x32xf32> to vector<16x32xf32>
    %13 = arith.addf %10, %12 : vector<16x32xf32>
    %14 = arith.truncf %13 : vector<16x32xf32> to vector<16x32xbf16>
    %c0_12 = arith.constant 0 : index
    %c0_13 = arith.constant 0 : index
    %15 = vector.load %arg6[%c0_12, %c0_13] : memref<32x32xbf16, #tpu.memory_space<vmem>>, vector<32x32xbf16>
    %cst_14 = arith.constant dense<0.000000e+00> : vector<16x32xf32>
    %16 = tpu.matmul %5, %15, %cst_14 {dimension_numbers = #tpu.dot_dimension_numbers<[1], [0], [0], [1], [0, 0, 1, 1], [], []>} : vector<16x32xbf16>, vector<32x32xbf16>, vector<16x32xf32> -> vector<16x32xf32>
    %c0_15 = arith.constant 0 : index
    %c0_16 = arith.constant 0 : index
    %17 = vector.load %arg7[%c0_15, %c0_16] : memref<1x32xf32, #tpu.memory_space<vmem>>, vector<1x32xf32>
    %18 = vector.broadcast %17 : vector<1x32xf32> to vector<16x32xf32>
    %19 = arith.addf %16, %18 : vector<16x32xf32>
    %20 = arith.truncf %19 : vector<16x32xf32> to vector<16x32xbf16>
    %c0_17 = arith.constant 0 : index
    %c0_18 = arith.constant 0 : index
    %21 = vector.load %arg8[%c0_17, %c0_18] : memref<32x32xbf16, #tpu.memory_space<vmem>>, vector<32x32xbf16>
    %cst_19 = arith.constant dense<0.000000e+00> : vector<16x32xf32>
    %22 = tpu.matmul %8, %21, %cst_19 {dimension_numbers = #tpu.dot_dimension_numbers<[1], [0], [0], [1], [0, 0, 1, 1], [], []>} : vector<16x32xbf16>, vector<32x32xbf16>, vector<16x32xf32> -> vector<16x32xf32>
    %c0_20 = arith.constant 0 : index
    %c0_21 = arith.constant 0 : index
    %23 = vector.load %arg9[%c0_20, %c0_21] : memref<1x32xf32, #tpu.memory_space<vmem>>, vector<1x32xf32>
    %24 = vector.broadcast %23 : vector<1x32xf32> to vector<16x32xf32>
    %25 = arith.addf %22, %24 : vector<16x32xf32>
    %26 = arith.truncf %25 : vector<16x32xf32> to vector<16x32xbf16>
    %27 = vector.extract_strided_slice %14 {offsets = [0, 0], sizes = [8, 32], strides = [1, 1]} : vector<16x32xbf16> to vector<8x32xbf16>
    %28 = vector.extract_strided_slice %20 {offsets = [0, 0], sizes = [8, 32], strides = [1, 1]} : vector<16x32xbf16> to vector<8x32xbf16>
    %29 = vector.extract_strided_slice %26 {offsets = [0, 0], sizes = [8, 32], strides = [1, 1]} : vector<16x32xbf16> to vector<8x32xbf16>
    %30 = vector.extract_strided_slice %27 {offsets = [0, 0], sizes = [8, 8], strides = [1, 1]} : vector<8x32xbf16> to vector<8x8xbf16>
    %31 = vector.extract_strided_slice %27 {offsets = [0, 8], sizes = [8, 8], strides = [1, 1]} : vector<8x32xbf16> to vector<8x8xbf16>
    %32 = vector.extract_strided_slice %27 {offsets = [0, 16], sizes = [8, 8], strides = [1, 1]} : vector<8x32xbf16> to vector<8x8xbf16>
    %33 = vector.extract_strided_slice %27 {offsets = [0, 24], sizes = [8, 8], strides = [1, 1]} : vector<8x32xbf16> to vector<8x8xbf16>
    %34 = vector.shape_cast %30 : vector<8x8xbf16> to vector<1x8x8xbf16>
    %35 = vector.shape_cast %31 : vector<8x8xbf16> to vector<1x8x8xbf16>
    %36 = vector.shape_cast %32 : vector<8x8xbf16> to vector<1x8x8xbf16>
    %37 = vector.shape_cast %33 : vector<8x8xbf16> to vector<1x8x8xbf16>
    %38 = tpu.concatenate %34, %35, %36, %37 in 0 : vector<1x8x8xbf16>, vector<1x8x8xbf16>, vector<1x8x8xbf16>, vector<1x8x8xbf16> -> vector<4x8x8xbf16>
    %39 = vector.extract_strided_slice %28 {offsets = [0, 0], sizes = [8, 8], strides = [1, 1]} : vector<8x32xbf16> to vector<8x8xbf16>
    %40 = vector.extract_strided_slice %28 {offsets = [0, 8], sizes = [8, 8], strides = [1, 1]} : vector<8x32xbf16> to vector<8x8xbf16>
    %41 = vector.extract_strided_slice %28 {offsets = [0, 16], sizes = [8, 8], strides = [1, 1]} : vector<8x32xbf16> to vector<8x8xbf16>
    %42 = vector.extract_strided_slice %28 {offsets = [0, 24], sizes = [8, 8], strides = [1, 1]} : vector<8x32xbf16> to vector<8x8xbf16>
    %43 = vector.shape_cast %39 : vector<8x8xbf16> to vector<1x8x8xbf16>
    %44 = vector.shape_cast %40 : vector<8x8xbf16> to vector<1x8x8xbf16>
    %45 = vector.shape_cast %41 : vector<8x8xbf16> to vector<1x8x8xbf16>
    %46 = vector.shape_cast %42 : vector<8x8xbf16> to vector<1x8x8xbf16>
    %47 = tpu.concatenate %43, %44, %45, %46 in 0 : vector<1x8x8xbf16>, vector<1x8x8xbf16>, vector<1x8x8xbf16>, vector<1x8x8xbf16> -> vector<4x8x8xbf16>
    %48 = vector.extract_strided_slice %29 {offsets = [0, 0], sizes = [8, 8], strides = [1, 1]} : vector<8x32xbf16> to vector<8x8xbf16>
    %49 = vector.extract_strided_slice %29 {offsets = [0, 8], sizes = [8, 8], strides = [1, 1]} : vector<8x32xbf16> to vector<8x8xbf16>
    %50 = vector.extract_strided_slice %29 {offsets = [0, 16], sizes = [8, 8], strides = [1, 1]} : vector<8x32xbf16> to vector<8x8xbf16>
    %51 = vector.extract_strided_slice %29 {offsets = [0, 24], sizes = [8, 8], strides = [1, 1]} : vector<8x32xbf16> to vector<8x8xbf16>
    %52 = vector.shape_cast %48 : vector<8x8xbf16> to vector<1x8x8xbf16>
    %53 = vector.shape_cast %49 : vector<8x8xbf16> to vector<1x8x8xbf16>
    %54 = vector.shape_cast %50 : vector<8x8xbf16> to vector<1x8x8xbf16>
    %55 = vector.shape_cast %51 : vector<8x8xbf16> to vector<1x8x8xbf16>
    %56 = tpu.concatenate %52, %53, %54, %55 in 0 : vector<1x8x8xbf16>, vector<1x8x8xbf16>, vector<1x8x8xbf16>, vector<1x8x8xbf16> -> vector<4x8x8xbf16>
    "tpu.trace_start"() <{level = 10 : i32, message = "hqd,hkd->hqk"}> : () -> ()
    %cst_22 = arith.constant dense<0.000000e+00> : vector<4x8x8xf32>
    %57 = tpu.matmul %38, %47, %cst_22 {dimension_numbers = #tpu.dot_dimension_numbers<[2], [2], [1], [1], [0, 0, 0, 1, 1, 1], [0], [0]>} : vector<4x8x8xbf16>, vector<4x8x8xbf16>, vector<4x8x8xf32> -> vector<4x8x8xf32>
    "tpu.trace_stop"() : () -> ()
    %cst_23 = arith.constant dense<0xFF800000> : vector<4x8xf32>
    %58 = vector.multi_reduction <maximumf>, %57, %cst_23 [2] : vector<4x8x8xf32> to vector<4x8xf32>
    %59 = vector.shape_cast %58 : vector<4x8xf32> to vector<4x8x1xf32>
    %60 = vector.broadcast %59 : vector<4x8x1xf32> to vector<4x8x8xf32>
    %61 = arith.subf %57, %60 : vector<4x8x8xf32>
    %62 = math.exp %61 : vector<4x8x8xf32>
    %cst_24 = arith.constant dense<0.000000e+00> : vector<4x8xf32>
    %63 = vector.multi_reduction <add>, %62, %cst_24 [2] : vector<4x8x8xf32> to vector<4x8xf32>
    %64 = vector.shape_cast %63 : vector<4x8xf32> to vector<4x8x1xf32>
    %65 = tpu.reciprocal %64 {approx = true} : vector<4x8x1xf32> -> vector<4x8x1xf32>
    %66 = vector.broadcast %65 : vector<4x8x1xf32> to vector<4x8x8xf32>
    %67 = arith.mulf %62, %66 : vector<4x8x8xf32>
    %68 = arith.truncf %67 : vector<4x8x8xf32> to vector<4x8x8xbf16>
    "tpu.trace_start"() <{level = 10 : i32, message = "hqk,hkd->hqd"}> : () -> ()
    %cst_25 = arith.constant dense<0.000000e+00> : vector<4x8x8xf32>
    %69 = tpu.matmul %68, %56, %cst_25 {dimension_numbers = #tpu.dot_dimension_numbers<[2], [1], [1], [2], [0, 0, 0, 1, 1, 2], [0], [0]>} : vector<4x8x8xbf16>, vector<4x8x8xbf16>, vector<4x8x8xf32> -> vector<4x8x8xf32>
    "tpu.trace_stop"() : () -> ()
    %70 = arith.truncf %69 : vector<4x8x8xf32> to vector<4x8x8xbf16>
    %71 = vector.extract_strided_slice %70 {offsets = [0, 0, 0], sizes = [1, 8, 8], strides = [1, 1, 1]} : vector<4x8x8xbf16> to vector<1x8x8xbf16>
    %72 = vector.shape_cast %71 : vector<1x8x8xbf16> to vector<8x8xbf16>
    %73 = vector.extract_strided_slice %70 {offsets = [1, 0, 0], sizes = [1, 8, 8], strides = [1, 1, 1]} : vector<4x8x8xbf16> to vector<1x8x8xbf16>
    %74 = vector.shape_cast %73 : vector<1x8x8xbf16> to vector<8x8xbf16>
    %75 = vector.extract_strided_slice %70 {offsets = [2, 0, 0], sizes = [1, 8, 8], strides = [1, 1, 1]} : vector<4x8x8xbf16> to vector<1x8x8xbf16>
    %76 = vector.shape_cast %75 : vector<1x8x8xbf16> to vector<8x8xbf16>
    %77 = vector.extract_strided_slice %70 {offsets = [3, 0, 0], sizes = [1, 8, 8], strides = [1, 1, 1]} : vector<4x8x8xbf16> to vector<1x8x8xbf16>
    %78 = vector.shape_cast %77 : vector<1x8x8xbf16> to vector<8x8xbf16>
    %79 = tpu.concatenate %72, %74, %76, %78 in 1 : vector<8x8xbf16>, vector<8x8xbf16>, vector<8x8xbf16>, vector<8x8xbf16> -> vector<8x32xbf16>
    %c0_26 = arith.constant 0 : index
    %c0_27 = arith.constant 0 : index
    %80 = vector.load %arg13[%c0_26, %c0_27] : memref<16x32xbf16, #tpu.memory_space<vmem>>, vector<8x32xbf16>
    tpu.vector_store %arg13[%c0_26, %c0_27], %79 {strides = array<i32>} : memref<16x32xbf16, #tpu.memory_space<vmem>>, vector<8x32xbf16>,
    %81 = vector.extract_strided_slice %14 {offsets = [8, 0], sizes = [8, 32], strides = [1, 1]} : vector<16x32xbf16> to vector<8x32xbf16>
    %82 = vector.extract_strided_slice %20 {offsets = [8, 0], sizes = [8, 32], strides = [1, 1]} : vector<16x32xbf16> to vector<8x32xbf16>
    %83 = vector.extract_strided_slice %26 {offsets = [8, 0], sizes = [8, 32], strides = [1, 1]} : vector<16x32xbf16> to vector<8x32xbf16>
    %84 = vector.extract_strided_slice %81 {offsets = [0, 0], sizes = [8, 8], strides = [1, 1]} : vector<8x32xbf16> to vector<8x8xbf16>
    %85 = vector.extract_strided_slice %81 {offsets = [0, 8], sizes = [8, 8], strides = [1, 1]} : vector<8x32xbf16> to vector<8x8xbf16>
    %86 = vector.extract_strided_slice %81 {offsets = [0, 16], sizes = [8, 8], strides = [1, 1]} : vector<8x32xbf16> to vector<8x8xbf16>
    %87 = vector.extract_strided_slice %81 {offsets = [0, 24], sizes = [8, 8], strides = [1, 1]} : vector<8x32xbf16> to vector<8x8xbf16>
    %88 = vector.shape_cast %84 : vector<8x8xbf16> to vector<1x8x8xbf16>
    %89 = vector.shape_cast %85 : vector<8x8xbf16> to vector<1x8x8xbf16>
    %90 = vector.shape_cast %86 : vector<8x8xbf16> to vector<1x8x8xbf16>
    %91 = vector.shape_cast %87 : vector<8x8xbf16> to vector<1x8x8xbf16>
    %92 = tpu.concatenate %88, %89, %90, %91 in 0 : vector<1x8x8xbf16>, vector<1x8x8xbf16>, vector<1x8x8xbf16>, vector<1x8x8xbf16> -> vector<4x8x8xbf16>
    %93 = vector.extract_strided_slice %82 {offsets = [0, 0], sizes = [8, 8], strides = [1, 1]} : vector<8x32xbf16> to vector<8x8xbf16>
    %94 = vector.extract_strided_slice %82 {offsets = [0, 8], sizes = [8, 8], strides = [1, 1]} : vector<8x32xbf16> to vector<8x8xbf16>
    %95 = vector.extract_strided_slice %82 {offsets = [0, 16], sizes = [8, 8], strides = [1, 1]} : vector<8x32xbf16> to vector<8x8xbf16>
    %96 = vector.extract_strided_slice %82 {offsets = [0, 24], sizes = [8, 8], strides = [1, 1]} : vector<8x32xbf16> to vector<8x8xbf16>
    %97 = vector.shape_cast %93 : vector<8x8xbf16> to vector<1x8x8xbf16>
    %98 = vector.shape_cast %94 : vector<8x8xbf16> to vector<1x8x8xbf16>
    %99 = vector.shape_cast %95 : vector<8x8xbf16> to vector<1x8x8xbf16>
    %100 = vector.shape_cast %96 : vector<8x8xbf16> to vector<1x8x8xbf16>
    %101 = tpu.concatenate %97, %98, %99, %100 in 0 : vector<1x8x8xbf16>, vector<1x8x8xbf16>, vector<1x8x8xbf16>, vector<1x8x8xbf16> -> vector<4x8x8xbf16>
    %102 = vector.extract_strided_slice %83 {offsets = [0, 0], sizes = [8, 8], strides = [1, 1]} : vector<8x32xbf16> to vector<8x8xbf16>
    %103 = vector.extract_strided_slice %83 {offsets = [0, 8], sizes = [8, 8], strides = [1, 1]} : vector<8x32xbf16> to vector<8x8xbf16>
    %104 = vector.extract_strided_slice %83 {offsets = [0, 16], sizes = [8, 8], strides = [1, 1]} : vector<8x32xbf16> to vector<8x8xbf16>
    %105 = vector.extract_strided_slice %83 {offsets = [0, 24], sizes = [8, 8], strides = [1, 1]} : vector<8x32xbf16> to vector<8x8xbf16>
    %106 = vector.shape_cast %102 : vector<8x8xbf16> to vector<1x8x8xbf16>
    %107 = vector.shape_cast %103 : vector<8x8xbf16> to vector<1x8x8xbf16>
    %108 = vector.shape_cast %104 : vector<8x8xbf16> to vector<1x8x8xbf16>
    %109 = vector.shape_cast %105 : vector<8x8xbf16> to vector<1x8x8xbf16>
    %110 = tpu.concatenate %106, %107, %108, %109 in 0 : vector<1x8x8xbf16>, vector<1x8x8xbf16>, vector<1x8x8xbf16>, vector<1x8x8xbf16> -> vector<4x8x8xbf16>
    "tpu.trace_start"() <{level = 10 : i32, message = "hqd,hkd->hqk"}> : () -> ()
    %cst_28 = arith.constant dense<0.000000e+00> : vector<4x8x8xf32>
    %111 = tpu.matmul %92, %101, %cst_28 {dimension_numbers = #tpu.dot_dimension_numbers<[2], [2], [1], [1], [0, 0, 0, 1, 1, 1], [0], [0]>} : vector<4x8x8xbf16>, vector<4x8x8xbf16>, vector<4x8x8xf32> -> vector<4x8x8xf32>
    "tpu.trace_stop"() : () -> ()
    %cst_29 = arith.constant dense<0xFF800000> : vector<4x8xf32>
    %112 = vector.multi_reduction <maximumf>, %111, %cst_29 [2] : vector<4x8x8xf32> to vector<4x8xf32>
    %113 = vector.shape_cast %112 : vector<4x8xf32> to vector<4x8x1xf32>
    %114 = vector.broadcast %113 : vector<4x8x1xf32> to vector<4x8x8xf32>
    %115 = arith.subf %111, %114 : vector<4x8x8xf32>
    %116 = math.exp %115 : vector<4x8x8xf32>
    %cst_30 = arith.constant dense<0.000000e+00> : vector<4x8xf32>
    %117 = vector.multi_reduction <add>, %116, %cst_30 [2] : vector<4x8x8xf32> to vector<4x8xf32>
    %118 = vector.shape_cast %117 : vector<4x8xf32> to vector<4x8x1xf32>
    %119 = tpu.reciprocal %118 {approx = true} : vector<4x8x1xf32> -> vector<4x8x1xf32>
    %120 = vector.broadcast %119 : vector<4x8x1xf32> to vector<4x8x8xf32>
    %121 = arith.mulf %116, %120 : vector<4x8x8xf32>
    %122 = arith.truncf %121 : vector<4x8x8xf32> to vector<4x8x8xbf16>
    "tpu.trace_start"() <{level = 10 : i32, message = "hqk,hkd->hqd"}> : () -> ()
    %cst_31 = arith.constant dense<0.000000e+00> : vector<4x8x8xf32>
    %123 = tpu.matmul %122, %110, %cst_31 {dimension_numbers = #tpu.dot_dimension_numbers<[2], [1], [1], [2], [0, 0, 0, 1, 1, 2], [0], [0]>} : vector<4x8x8xbf16>, vector<4x8x8xbf16>, vector<4x8x8xf32> -> vector<4x8x8xf32>
    "tpu.trace_stop"() : () -> ()
    %124 = arith.truncf %123 : vector<4x8x8xf32> to vector<4x8x8xbf16>
    %125 = vector.extract_strided_slice %124 {offsets = [0, 0, 0], sizes = [1, 8, 8], strides = [1, 1, 1]} : vector<4x8x8xbf16> to vector<1x8x8xbf16>
    %126 = vector.shape_cast %125 : vector<1x8x8xbf16> to vector<8x8xbf16>
    %127 = vector.extract_strided_slice %124 {offsets = [1, 0, 0], sizes = [1, 8, 8], strides = [1, 1, 1]} : vector<4x8x8xbf16> to vector<1x8x8xbf16>
    %128 = vector.shape_cast %127 : vector<1x8x8xbf16> to vector<8x8xbf16>
    %129 = vector.extract_strided_slice %124 {offsets = [2, 0, 0], sizes = [1, 8, 8], strides = [1, 1, 1]} : vector<4x8x8xbf16> to vector<1x8x8xbf16>
    %130 = vector.shape_cast %129 : vector<1x8x8xbf16> to vector<8x8xbf16>
    %131 = vector.extract_strided_slice %124 {offsets = [3, 0, 0], sizes = [1, 8, 8], strides = [1, 1, 1]} : vector<4x8x8xbf16> to vector<1x8x8xbf16>
    %132 = vector.shape_cast %131 : vector<1x8x8xbf16> to vector<8x8xbf16>
    %133 = tpu.concatenate %126, %128, %130, %132 in 1 : vector<8x8xbf16>, vector<8x8xbf16>, vector<8x8xbf16>, vector<8x8xbf16> -> vector<8x32xbf16>
    %c8 = arith.constant 8 : index
    %c0_32 = arith.constant 0 : index
    %134 = vector.load %arg13[%c8, %c0_32] : memref<16x32xbf16, #tpu.memory_space<vmem>>, vector<8x32xbf16>
    tpu.vector_store %arg13[%c8, %c0_32], %133 {strides = array<i32>} : memref<16x32xbf16, #tpu.memory_space<vmem>>, vector<8x32xbf16>,
    %c0_33 = arith.constant 0 : index
    %c0_34 = arith.constant 0 : index
    %135 = vector.load %arg13[%c0_33, %c0_34] : memref<16x32xbf16, #tpu.memory_space<vmem>>, vector<16x32xbf16>
    %c0_35 = arith.constant 0 : index
    %c0_36 = arith.constant 0 : index
    %136 = vector.load %arg10[%c0_35, %c0_36] : memref<32x32xbf16, #tpu.memory_space<vmem>>, vector<32x32xbf16>
    %cst_37 = arith.constant dense<0.000000e+00> : vector<16x32xf32>
    %137 = tpu.matmul %135, %136, %cst_37 {dimension_numbers = #tpu.dot_dimension_numbers<[1], [0], [0], [1], [0, 0, 1, 1], [], []>} : vector<16x32xbf16>, vector<32x32xbf16>, vector<16x32xf32> -> vector<16x32xf32>
    %c0_38 = arith.constant 0 : index
    %c0_39 = arith.constant 0 : index
    %138 = vector.load %arg11[%c0_38, %c0_39] : memref<1x32xf32, #tpu.memory_space<vmem>>, vector<1x32xf32>
    %139 = vector.broadcast %138 : vector<1x32xf32> to vector<16x32xf32>
    %140 = arith.addf %137, %139 : vector<16x32xf32>
    %141 = vector.shape_cast %140 : vector<16x32xf32> to vector<2x8x32xf32>
    %c0_40 = arith.constant 0 : index
    %c0_41 = arith.constant 0 : index
    %c0_42 = arith.constant 0 : index
    %142 = vector.load %arg12[%c0_40, %c0_41, %c0_42] : memref<2x8x32xf32, #tpu.memory_space<vmem>>, vector<2x8x32xf32>
    tpu.vector_store %arg12[%c0_40, %c0_41, %c0_42], %141 {strides = array<i32>} : memref<2x8x32xf32, #tpu.memory_space<vmem>>, vector<2x8x32xf32>,
    return
  }
  func.func @transform_0(%arg0: i32) -> (i32, i32, i32) {
    %c0_i32 = arith.constant 0 : i32
    %c0_i32_0 = arith.constant 0 : i32
    %c0_i32_1 = arith.constant 0 : i32
    return %arg0, %c0_i32, %c0_i32_0 : i32, i32, i32
  }
  func.func @transform_1(%arg0: i32) -> (i32, i32, i32) {
    %c0_i32 = arith.constant 0 : i32
    %c0_i32_0 = arith.constant 0 : i32
    %c0_i32_1 = arith.constant 0 : i32
    return %arg0, %c0_i32, %c0_i32_0 : i32, i32, i32
  }
  func.func @transform_2(%arg0: i32) -> (i32, i32, i32) {
    %c0_i32 = arith.constant 0 : i32
    %c0_i32_0 = arith.constant 0 : i32
    %c0_i32_1 = arith.constant 0 : i32
    return %arg0, %c0_i32, %c0_i32_0 : i32, i32, i32
  }
  func.func @transform_3(%arg0: i32) -> (i32, i32) {
    %c0_i32 = arith.constant 0 : i32
    %c0_i32_0 = arith.constant 0 : i32
    %c0_i32_1 = arith.constant 0 : i32
    return %c0_i32, %c0_i32_0 : i32, i32
  }
  func.func @transform_4(%arg0: i32) -> (i32, i32) {
    %c0_i32 = arith.constant 0 : i32
    %c0_i32_0 = arith.constant 0 : i32
    %c0_i32_1 = arith.constant 0 : i32
    return %c0_i32, %c0_i32_0 : i32, i32
  }
  func.func @transform_5(%arg0: i32) -> (i32, i32) {
    %c0_i32 = arith.constant 0 : i32
    %c0_i32_0 = arith.constant 0 : i32
    %c0_i32_1 = arith.constant 0 : i32
    return %c0_i32, %c0_i32_0 : i32, i32
  }
  func.func @transform_6(%arg0: i32) -> (i32, i32) {
    %c0_i32 = arith.constant 0 : i32
    %c0_i32_0 = arith.constant 0 : i32
    %c0_i32_1 = arith.constant 0 : i32
    return %c0_i32, %c0_i32_0 : i32, i32
  }
  func.func @transform_7(%arg0: i32) -> (i32, i32) {
    %c0_i32 = arith.constant 0 : i32
    %c0_i32_0 = arith.constant 0 : i32
    %c0_i32_1 = arith.constant 0 : i32
    return %c0_i32, %c0_i32_0 : i32, i32
  }
  func.func @transform_8(%arg0: i32) -> (i32, i32) {
    %c0_i32 = arith.constant 0 : i32
    %c0_i32_0 = arith.constant 0 : i32
    %c0_i32_1 = arith.constant 0 : i32
    return %c0_i32, %c0_i32_0 : i32, i32
  }
  func.func @transform_9(%arg0: i32) -> (i32, i32) {
    %c0_i32 = arith.constant 0 : i32
    %c0_i32_0 = arith.constant 0 : i32
    %c0_i32_1 = arith.constant 0 : i32
    return %c0_i32, %c0_i32_0 : i32, i32
  }
  func.func @transform_10(%arg0: i32) -> (i32, i32) {
    %c0_i32 = arith.constant 0 : i32
    %c0_i32_0 = arith.constant 0 : i32
    %c0_i32_1 = arith.constant 0 : i32
    return %c0_i32, %c0_i32_0 : i32, i32
  }
  func.func @transform_11(%arg0: i32) -> (i32, i32, i32) {
    %c0_i32 = arith.constant 0 : i32
    %c0_i32_0 = arith.constant 0 : i32
    %c0_i32_1 = arith.constant 0 : i32
    return %arg0, %c0_i32, %c0_i32_0 : i32, i32, i32
  }
}

</mosaic_0001>

<bundles_post_ra>
// kernel: tpu_custom_call.1
= control target key start
LH: loop header
LB: loop body
LE: loop exit
PB: predicated region body
PF: predicated region fallthrough
CT: control target
= control target key end

     0   :  { %16 = vsyncpa [#allocation4], 0  ;;  %s2425_s0 = inlined_call_operand.hbm [shape: f32[2,8,32], index: 0, kind: input, shape index: {}]   ;;  %s2426_s1 = inlined_call_operand.hbm [shape: f32[2,8,32], index: 1, kind: input, shape index: {}]   ;;  %s2427_s2 = inlined_call_operand.hbm [shape: f32[2,8,32], index: 2, kind: input, shape index: {}]   ;;  %s2428_s3 = inlined_call_operand.hbm [shape: bf16[32,32], index: 3, kind: input, shape index: {}]   ;;  %s2429_s4 = inlined_call_operand.hbm [shape: f32[1,32], index: 4, kind: input, shape index: {}]   ;;  %s2430_s5 = inlined_call_operand.hbm [shape: bf16[32,32], index: 5, kind: input, shape index: {}]   ;;  %s2431_s6 = inlined_call_operand.hbm [shape: f32[1,32], index: 6, kind: input, shape index: {}]   ;;  %s2432_s7 = inlined_call_operand.hbm [shape: bf16[32,32], index: 7, kind: input, shape index: {}]   ;;  %s2433_s8 = inlined_call_operand.hbm [shape: f32[1,32], index: 8, kind: input, shape index: {}]   ;;  %s2434_s9 = inlined_call_operand.hbm [shape: bf16[32,32], index: 9, kind: input, shape index: {}]   ;;  %s2435_s10 = inlined_call_operand.hbm [shape: f32[1,32], index: 10, kind: input, shape index: {}]   ;;  %s2436_s11 = inlined_call_operand.hbm [shape: f32[2,8,32], index: 11, kind: output, shape index: {}]  }
   0x1   :  { %17 = vsyncpa [#allocation7], 0 }
   0x2   :  { %18 = vsyncpa [#allocation10], 0 }
   0x3   :  { %19 = vsyncpa [#allocation13], 0 }
   0x4   :  { %20 = vsyncpa [#allocation16], 0 }
   0x5   :  { %21 = vsyncpa [#allocation19], 0 }
   0x6   :  { %22 = vsyncpa [#allocation5], 0  ;;  %s1949_s17 = smov [#allocation6]   ;;  %s1950_s19 = smov [#allocation9]  }
   0x7   :  { %s40_s18 = sshll.u32 %s1949_s17, 4  ;;  %s64_s20 = sshll.u32 %s1950_s19, 4  ;;  %s41_s18 = int_to_ptr.vmem [resolvable:$true] %s40_s18  ;;  %s2032_s20 = int_to_ptr.vmem [resolvable:$true] %s64_s20 }
   0x8   :  { %s1671_s23 = scalar_lea.hbm %s2426_s1, 256 }
   0x9   :  { %p1672_p0 = scmp.ne.s32.totalorder %s2426_s1, %s1671_s23  ;;  %p1675_p1 = scmp.lt.u32.totalorder %s1671_s23, %s2426_s1 }
   0xb   :  { %p1677_p2 = pnand %p1675_p1, %p1672_p0 }
   0xd   :  { %1680 = shalt.err (!%p1677_p2)
}
   0xe   :  { %s1681_s28 = scalar_lea.vmem %s41_s18, 256  ;;  %p1686_p4 = scmp.lt.s32.totalorder %s41_s18, %s41_s18 }
   0xf   :  { %p1682_p3 = scmp.ne.s32.totalorder %s41_s18, %s1681_s28  ;;  %p1687_p5 = scmp.lt.s32.totalorder %s1681_s28, %s1681_s28 }
  0x11   :  { %p1688_p6 = por %p1687_p5, %p1686_p4 }
  0x13   :  { %p1689_p7 = pnand %p1688_p6, %p1682_p3 }
  0x15   :  { %1692 = shalt.err (!%p1689_p7)
}
  0x16   :  { %s1951_s29 = smov 128   ;;  %s1952_s30 = smov 8  }
  0x17   :  { %46 = dma.hbm_to_vmem [thread:$0]  %s2426_s1, 256, %s41_s18, [#allocation7], %s1951_s29, %s1951_s29, %s1952_s30  }
  0x18   :  { %s1693_s16 = scalar_lea.hbm %s2428_s3, 256 }
  0x19   :  { %p1694_p8 = scmp.ne.s32.totalorder %s2428_s3, %s1693_s16  ;;  %p1697_p9 = scmp.lt.u32.totalorder %s1693_s16, %s2428_s3 }
  0x1b   :  { %p1699_p10 = pnand %p1697_p9, %p1694_p8 }
  0x1d   :  { %1702 = shalt.err (!%p1699_p10)
}
  0x1e   :  { %s1703_s23 = scalar_lea.vmem %s2032_s20, 256  ;;  %p1708_p12 = scmp.lt.s32.totalorder %s2032_s20, %s2032_s20 }
  0x1f   :  { %p1704_p11 = scmp.ne.s32.totalorder %s2032_s20, %s1703_s23  ;;  %p1709_p13 = scmp.lt.s32.totalorder %s1703_s23, %s1703_s23 }
  0x21   :  { %p1710_p0 = por %p1709_p13, %p1708_p12 }
  0x23   :  { %p1711_p1 = pnand %p1710_p0, %p1704_p11 }
  0x25   :  { %1714 = shalt.err (!%p1711_p1)
}
  0x26   :  { %s1953_s1 = smov 64   ;;  %s1954_s18 = smov 4  }
  0x27   :  { %70 = dma.hbm_to_vmem [thread:$0]  %s2428_s3, 256, %s2032_s20, [#allocation10], %s1953_s1, %s1953_s1, %s1954_s18  }
  0x28   :  { %s1955_s26 = smov [#allocation12]   ;;  %s1956_s28 = smov [#allocation15]  }
  0x29   :  { %s86_s27 = sshll.u32 %s1955_s26, 4  ;;  %s108_s12 = sshll.u32 %s1956_s28, 4  ;;  %s87_s27 = int_to_ptr.vmem [resolvable:$true] %s86_s27  ;;  %s2069_s12 = int_to_ptr.vmem [resolvable:$true] %s108_s12 }
  0x2a   :  { %s1715_s15 = scalar_lea.hbm %s2430_s5, 256 }
  0x2b   :  { %p1716_p2 = scmp.ne.s32.totalorder %s2430_s5, %s1715_s15  ;;  %p1719_p3 = scmp.lt.u32.totalorder %s1715_s15, %s2430_s5 }
  0x2d   :  { %p1721_p4 = pnand %p1719_p3, %p1716_p2 }
  0x2f   :  { %1724 = shalt.err (!%p1721_p4)
}
  0x30   :  { %s1725_s3 = scalar_lea.vmem %s87_s27, 256  ;;  %p1730_p6 = scmp.lt.s32.totalorder %s87_s27, %s87_s27 }
  0x31   :  { %p1726_p5 = scmp.ne.s32.totalorder %s87_s27, %s1725_s3  ;;  %p1731_p7 = scmp.lt.s32.totalorder %s1725_s3, %s1725_s3 }
  0x33   :  { %p1732_p8 = por %p1731_p7, %p1730_p6 }
  0x35   :  { %p1733_p9 = pnand %p1732_p8, %p1726_p5 }
  0x37   :  { %1736 = shalt.err (!%p1733_p9)
}
  0x38   :  { %92 = dma.hbm_to_vmem [thread:$0]  %s2430_s5, 256, %s87_s27, [#allocation13], %s1953_s1, %s1953_s1, %s1954_s18  }
  0x39   :  { %s1737_s25 = scalar_lea.hbm %s2432_s7, 256 }
  0x3a   :  { %p1738_p10 = scmp.ne.s32.totalorder %s2432_s7, %s1737_s25  ;;  %p1741_p11 = scmp.lt.u32.totalorder %s1737_s25, %s2432_s7 }
  0x3c   :  { %p1743_p12 = pnand %p1741_p11, %p1738_p10 }
  0x3e   :  { %1746 = shalt.err (!%p1743_p12)
}
  0x3f   :  { %s1747_s15 = scalar_lea.vmem %s2069_s12, 256  ;;  %p1752_p0 = scmp.lt.s32.totalorder %s2069_s12, %s2069_s12 }
  0x40   :  { %p1748_p13 = scmp.ne.s32.totalorder %s2069_s12, %s1747_s15  ;;  %p1753_p1 = scmp.lt.s32.totalorder %s1747_s15, %s1747_s15 }
  0x42   :  { %p1754_p2 = por %p1753_p1, %p1752_p0 }
  0x44   :  { %p1755_p3 = pnand %p1754_p2, %p1748_p13 }
  0x46   :  { %1758 = shalt.err (!%p1755_p3)
}
  0x47   :  { %114 = dma.hbm_to_vmem [thread:$0]  %s2432_s7, 256, %s2069_s12, [#allocation16], %s1953_s1, %s1953_s1, %s1954_s18  }
  0x48   :  { %s1957_s16 = smov [#allocation18]   ;;  %s1958_s19 = smov [#allocation3]  }
  0x49   :  { %s130_s17 = sshll.u32 %s1957_s16, 4  ;;  %s28_s21 = sshll.u32 %s1958_s19, 4  ;;  %s131_s17 = int_to_ptr.vmem [resolvable:$true] %s130_s17  ;;  %s2106_s21 = int_to_ptr.vmem [resolvable:$true] %s28_s21 }
  0x4a   :  { %s1759_s22 = scalar_lea.hbm %s2434_s9, 256 }
  0x4b   :  { %p1760_p4 = scmp.ne.s32.totalorder %s2434_s9, %s1759_s22  ;;  %p1763_p5 = scmp.lt.u32.totalorder %s1759_s22, %s2434_s9 }
  0x4d   :  { %p1765_p6 = pnand %p1763_p5, %p1760_p4 }
  0x4f   :  { %1768 = shalt.err (!%p1765_p6)
}
  0x50   :  { %s1769_s7 = scalar_lea.vmem %s131_s17, 256  ;;  %p1774_p8 = scmp.lt.s32.totalorder %s131_s17, %s131_s17 }
  0x51   :  { %p1770_p7 = scmp.ne.s32.totalorder %s131_s17, %s1769_s7  ;;  %p1775_p9 = scmp.lt.s32.totalorder %s1769_s7, %s1769_s7 }
  0x53   :  { %p1776_p10 = por %p1775_p9, %p1774_p8 }
  0x55   :  { %p1777_p11 = pnand %p1776_p10, %p1770_p7 }
  0x57   :  { %1780 = shalt.err (!%p1777_p11)
}
  0x58   :  { %136 = dma.hbm_to_vmem [thread:$0]  %s2434_s9, 256, %s131_s17, [#allocation19], %s1953_s1, %s1953_s1, %s1954_s18  }
  0x59   :  { %s1781_s15 = scalar_lea.hbm %s2425_s0, 256 }
  0x5a   :  { %p1782_p12 = scmp.ne.s32.totalorder %s2425_s0, %s1781_s15  ;;  %p1785_p13 = scmp.lt.u32.totalorder %s1781_s15, %s2425_s0 }
  0x5c   :  { %p1787_p0 = pnand %p1785_p13, %p1782_p12 }
  0x5e   :  { %1790 = shalt.err (!%p1787_p0)
}
  0x5f   :  { %s1791_s3 = scalar_lea.vmem %s2106_s21, 256  ;;  %p1796_p2 = scmp.lt.s32.totalorder %s2106_s21, %s2106_s21 }
  0x60   :  { %p1792_p1 = scmp.ne.s32.totalorder %s2106_s21, %s1791_s3  ;;  %p1797_p3 = scmp.lt.s32.totalorder %s1791_s3, %s1791_s3 }
  0x62   :  { %p1798_p4 = por %p1797_p3, %p1796_p2 }
  0x64   :  { %p1799_p5 = pnand %p1798_p4, %p1792_p1 }
  0x66   :  { %1802 = shalt.err (!%p1799_p5)
}
  0x67   :  { %34 = dma.hbm_to_vmem [thread:$0]  %s2425_s0, 256, %s2106_s21, [#allocation4], %s1951_s29, %s1951_s29, %s1952_s30  }
  0x68   :  { %s1959_s18 = smov [#allocation8]   ;;  %s1960_s20 = smov [#allocation11]  }
  0x69   :  { %s52_s17 = sshll.u32 %s1959_s18, 4  ;;  %s77_s22 = sshll.u32 %s1960_s20, 4  ;;  %s53_s17 = int_to_ptr.vmem [resolvable:$true] %s52_s17  ;;  %s78_s22 = int_to_ptr.vmem [resolvable:$true] %s77_s22 }
  0x6a   :  { %s1803_s25 = scalar_lea.hbm %s2427_s2, 256 }
  0x6b   :  { %p1804_p6 = scmp.ne.s32.totalorder %s2427_s2, %s1803_s25  ;;  %p1807_p7 = scmp.lt.u32.totalorder %s1803_s25, %s2427_s2 }
  0x6d   :  { %p1809_p8 = pnand %p1807_p7, %p1804_p6 }
  0x6f   :  { %1812 = shalt.err (!%p1809_p8)
}
  0x70   :  { %s1813_s0 = scalar_lea.vmem %s53_s17, 256  ;;  %p1818_p10 = scmp.lt.s32.totalorder %s53_s17, %s53_s17 }
  0x71   :  { %p1814_p9 = scmp.ne.s32.totalorder %s53_s17, %s1813_s0  ;;  %p1819_p11 = scmp.lt.s32.totalorder %s1813_s0, %s1813_s0 }
  0x73   :  { %p1820_p12 = por %p1819_p11, %p1818_p10 }
  0x75   :  { %p1821_p13 = pnand %p1820_p12, %p1814_p9 }
  0x77   :  { %1824 = shalt.err (!%p1821_p13)
}
  0x78   :  { %58 = dma.hbm_to_vmem [thread:$0]  %s2427_s2, 256, %s53_s17, [#allocation7], %s1951_s29, %s1951_s29, %s1952_s30  }
  0x79   :  { %s1825_s5 = scalar_lea.hbm %s2429_s4, 16 }
  0x7a   :  { %p1826_p0 = scmp.ne.s32.totalorder %s2429_s4, %s1825_s5  ;;  %p1829_p1 = scmp.lt.u32.totalorder %s1825_s5, %s2429_s4 }
  0x7c   :  { %p1831_p2 = pnand %p1829_p1, %p1826_p0 }
  0x7e   :  { %1834 = shalt.err (!%p1831_p2)
}
  0x7f   :  { %s1835_s9 = scalar_lea.vmem %s78_s22, 16  ;;  %s1839_s1 = scalar_lea.vmem %s78_s22, 32 }
  0x80   :  { %p1836_p3 = scmp.ne.s32.totalorder %s78_s22, %s1835_s9  ;;  %p1840_p4 = scmp.lt.s32.totalorder %s78_s22, %s78_s22 }
  0x81   :  { %p1841_p5 = scmp.lt.s32.totalorder %s1839_s1, %s1835_s9 }
  0x83   :  { %p1842_p6 = por %p1841_p5, %p1840_p4 }
  0x85   :  { %p1843_p7 = pnand %p1842_p6, %p1836_p3 }
  0x87   :  { %1846 = shalt.err (!%p1843_p7)
}
  0x88   :  { %80 = dma.hbm_to_vmem [thread:$0]  %s2429_s4, 16, %s78_s22, [#allocation10]  }
  0x89   :  { %s1961_s17 = smov [#allocation14]   ;;  %s1962_s23 = smov [#allocation17]  }
  0x8a   :  { %s99_s20 = sshll.u32 %s1961_s17, 4  ;;  %s121_s24 = sshll.u32 %s1962_s23, 4  ;;  %s100_s20 = int_to_ptr.vmem [resolvable:$true] %s99_s20  ;;  %s122_s24 = int_to_ptr.vmem [resolvable:$true] %s121_s24 }
  0x8b   :  { %s1847_s7 = scalar_lea.hbm %s2431_s6, 16 }
  0x8c   :  { %p1848_p8 = scmp.ne.s32.totalorder %s2431_s6, %s1847_s7  ;;  %p1851_p9 = scmp.lt.u32.totalorder %s1847_s7, %s2431_s6 }
  0x8e   :  { %p1853_p10 = pnand %p1851_p9, %p1848_p8 }
  0x90   :  { %1856 = shalt.err (!%p1853_p10)
}
  0x91   :  { %s1857_s4 = scalar_lea.vmem %s100_s20, 16  ;;  %s1861_s22 = scalar_lea.vmem %s100_s20, 32 }
  0x92   :  { %p1858_p11 = scmp.ne.s32.totalorder %s100_s20, %s1857_s4  ;;  %p1862_p12 = scmp.lt.s32.totalorder %s100_s20, %s100_s20 }
  0x93   :  { %p1863_p13 = scmp.lt.s32.totalorder %s1861_s22, %s1857_s4 }
  0x95   :  { %p1864_p0 = por %p1863_p13, %p1862_p12 }
  0x97   :  { %p1865_p1 = pnand %p1864_p0, %p1858_p11 }
  0x99   :  { %1868 = shalt.err (!%p1865_p1)
}
  0x9a   :  { %102 = dma.hbm_to_vmem [thread:$0]  %s2431_s6, 16, %s100_s20, [#allocation13]  }
  0x9b   :  { %s1869_s27 = scalar_lea.hbm %s2433_s8, 16 }
  0x9c   :  { %p1870_p2 = scmp.ne.s32.totalorder %s2433_s8, %s1869_s27  ;;  %p1873_p3 = scmp.lt.u32.totalorder %s1869_s27, %s2433_s8 }
  0x9e   :  { %p1875_p4 = pnand %p1873_p3, %p1870_p2 }
  0xa0   :  { %1878 = shalt.err (!%p1875_p4)
}
  0xa1   :  { %s1879_s1 = scalar_lea.vmem %s122_s24, 16  ;;  %s1883_s2 = scalar_lea.vmem %s122_s24, 32 }
  0xa2   :  { %p1880_p5 = scmp.ne.s32.totalorder %s122_s24, %s1879_s1  ;;  %p1884_p6 = scmp.lt.s32.totalorder %s122_s24, %s122_s24 }
  0xa3   :  { %p1885_p7 = scmp.lt.s32.totalorder %s1883_s2, %s1879_s1 }
  0xa5   :  { %p1886_p8 = por %p1885_p7, %p1884_p6 }
  0xa7   :  { %p1887_p9 = pnand %p1886_p8, %p1880_p5 }
  0xa9   :  { %1890 = shalt.err (!%p1887_p9)
}
  0xaa   :  { %124 = dma.hbm_to_vmem [thread:$0]  %s2433_s8, 16, %s122_s24, [#allocation16]  }
  0xab   :  { %s1963_s17 = smov [#allocation20]   ;;  %s1891_s26 = scalar_lea.hbm %s2435_s10, 16 }
  0xac   :  { %s143_s20 = sshll.u32 %s1963_s17, 4  ;;  %p1892_p10 = scmp.ne.s32.totalorder %s2435_s10, %s1891_s26  ;;  %s144_s20 = int_to_ptr.vmem [resolvable:$true] %s143_s20 }
  0xad   :  { %p1895_p11 = scmp.lt.u32.totalorder %s1891_s26, %s2435_s10 }
  0xaf   :  { %p1897_p12 = pnand %p1895_p11, %p1892_p10 }
  0xb1   :  { %1900 = shalt.err (!%p1897_p12)
}
  0xb2   :  { %s1901_s21 = scalar_lea.vmem %s144_s20, 16  ;;  %s1905_s8 = scalar_lea.vmem %s144_s20, 32 }
  0xb3   :  { %p1902_p13 = scmp.ne.s32.totalorder %s144_s20, %s1901_s21  ;;  %p1906_p0 = scmp.lt.s32.totalorder %s144_s20, %s144_s20 }
  0xb4   :  { %p1907_p1 = scmp.lt.s32.totalorder %s1905_s8, %s1901_s21 }
  0xb6   :  { %p1908_p2 = por %p1907_p1, %p1906_p0 }
  0xb8   :  { %p1909_p3 = pnand %p1908_p2, %p1902_p13 }
  0xba   :  { %1912 = shalt.err (!%p1909_p3)
}
  0xbb   :  { %146 = dma.hbm_to_vmem [thread:$0]  %s2435_s10, 16, %s144_s20, [#allocation19]  }
  0xbc   :  { %1935 = dma.done.wait [#allocation4], 256  }
  0xbd   :  { %1936 = vsyncadd [#allocation4], 4294967040 }
  0xbe   :  { %1937 = dma.done.wait [#allocation7], 512  }
  0xbf   :  { %1938 = vsyncadd [#allocation7], 4294966784 }
  0xc0   :  { %1939 = dma.done.wait [#allocation10], 272  }
  0xc1   :  { %1940 = vsyncadd [#allocation10], 4294967024 }
  0xc2   :  { %1941 = dma.done.wait [#allocation13], 272  }
  0xc3   :  { %1942 = vsyncadd [#allocation13], 4294967024 }
  0xc4   :  { %1943 = dma.done.wait [#allocation16], 272  }
  0xc5   :  { %1944 = vsyncadd [#allocation16], 4294967024 }
  0xc6   :  { %1945 = dma.done.wait [#allocation19], 272  }
  0xc7   :  { %1946 = vsyncadd [#allocation19], 4294967024  ;;  %v1964_v0 = vmov 0.0   ;;  %vm1965_vm0 = vmmov 0   ;;  %v1631_v1 = vld [vmem:[#allocation9] sm:$0xff]   ;;  %v1632_v2 = vld [vmem:[#allocation12] sm:$0xff]  }
  0xc8   :  { %1480 = vmatprep.subr.bf16.mxu0 %v1964_v0  ;;  %1488 = vmatprep.subr.bf16.mxu1 %v1964_v0  ;;  %v1633_v3 = vld [vmem:[#allocation9 + $0x8] sm:$0xff]   ;;  %v1634_v4 = vld [vmem:[#allocation12 + $0x8] sm:$0xff]   ;;  %v181_v5 = vld [vmem:[#allocation3] sm:$0xff]  ;;  %vm213_vm1 = vcmask 261120   ;;  %vm416_vm2 = vcmask 64512   ;;  %s1966_s10 = smov 120  }
  0xc9   :  { %1484 = vmatprep.mubr.msk.bf16.mxu0 %vm1965_vm0, %v1964_v0  ;;  %1492 = vmatprep.mubr.msk.bf16.mxu1 %vm1965_vm0, %v1964_v0  ;;  %v182_v6 = vld [vmem:[#allocation3 + $0x8] sm:$0xff]  ;;  %v184_v7 = vld [vmem:[#allocation6] sm:$0xff]  ;;  %v185_v9 = vld [vmem:[#allocation6 + $0x8] sm:$0xff]  ;;  %s1967_s22 = smov 104   ;;  %s1968_s13 = smov 112   ;;  %vm652_vm3 = vcmask 1043456  }
  0xca   :  { %1481 = vmatpush3.bf16.msra.mxu0 %v1631_v1  ;;  %1489 = vmatpush3.bf16.msra.mxu1 %v1632_v2  ;;  %v183_v8 = vpack.c.bf16 %v182_v6, %v181_v5  ;;  %v186_v10 = vpack.c.bf16 %v185_v9, %v184_v7  ;;  %v1635_v11 = vld [vmem:[#allocation15] sm:$0xff]   ;;  %v1636_v12 = vld [vmem:[#allocation15 + $0x8] sm:$0xff]   ;;  %v188_v14 = vld [vmem:[#allocation8 + $0x8] sm:$0xff]  ;;  %s1969_s14 = smov 16   ;;  %s1970_s15 = smov 24   ;;  %vm850_vm4 = vcmask 130048  }
  0xcb   :  { %1482 = vmatprep.subr.bf16.mxu0 %v1964_v0  ;;  %1490 = vmatprep.subr.bf16.mxu1 %v1964_v0  ;;  %v187_v13 = vld [vmem:[#allocation8] sm:$0xff]  ;;  %v1408_v19 = vld [vmem:[#allocation14] ss:$0 sm:$0xff]  ;;  %vm853_vm5 = vcmask 195584   ;;  %vm1310_vm6 = vcmask 261124   ;;  %vm857_vm7 = vcmask 257024  }
  0xcc   :  { %v189_v15 = vpack.c.bf16 %v188_v14, %v187_v13  ;;  %v1404_v16 = vld [vmem:[#allocation11] ss:$0 sm:$0xff]  ;;  %v1412_v33 = vld [vmem:[#allocation17] ss:$0 sm:$0xff]  ;;  %s1971_s5 = smov [#allocation21]  }
  0xcd   :  { %s1387_s27 = sshll.u32 %s1971_s5, 4  ;;  %s1388_s27 = int_to_ptr.vmem [resolvable:$true] %s1387_s27 }
  0xce   :  { %1483 = vmatpush3.bf16.msra.mxu0 %v1633_v3  ;;  %1491 = vmatpush3.bf16.msra.mxu1 %v1634_v4  ;;  %s1913_s16 = scalar_lea.vmem %s1388_s27, 256  ;;  %p1918_p5 = scmp.lt.s32.totalorder %s1388_s27, %s1388_s27 }
  0xcf   :  { %1496 = vmatprep.subr.bf16.mxu0 %v1964_v0  ;;  %1504 = vmatprep.subr.bf16.mxu1 %v1964_v0  ;;  %p1914_p4 = scmp.ne.s32.totalorder %s1388_s27, %s1913_s16  ;;  %p1919_p6 = scmp.lt.s32.totalorder %s1913_s16, %s1913_s16 }
  0xd1   :  { %1485 = vmatmul.mubr.msk.bf16.vlgmr.msra.gmra.mrb[0].mxu0 %vm213_vm1, %v183_v8  ;;  %1493 = vmatmul.mubr.msk.bf16.vlgmr.msra.gmra.mrb[0].mxu1 %vm213_vm1, %v186_v10  ;;  %p1920_p7 = por %p1919_p6, %p1918_p5 }
  0xd2   :  { %1500 = vmatprep.mubr.msk.bf16.mxu0 %vm1965_vm0, %v1964_v0  ;;  %1506 = vmatprep.mubr.msk.bf16.mxu1 %vm1965_vm0, %v1964_v0 }
  0xd3   :  { %1497 = vmatpush3.bf16.msra.mxu0 %v1635_v11  ;;  %p1921_p8 = pnand %p1920_p7, %p1914_p4 }
  0xd4   :  { %1498 = vmatprep.subr.bf16.mxu0 %v1964_v0 }
  0xd7   :  { %1499 = vmatpush3.bf16.msra.mxu0 %v1636_v12 }
  0xd8   :  { %1510 = vmatprep.subr.bf16.mxu0 %v1964_v0 }
  0xda   :  { %1501 = vmatmul.mubr.msk.bf16.vlgmr.msra.gmra.mrb[4].mxu0 %vm213_vm1, %v189_v15 }
  0xdb   :  { %1512 = vmatprep.mubr.msk.bf16.mxu0 %vm1965_vm0, %v1964_v0 }
 0x1a4   :  { %v251_v17 = vpop.f32.mrb[0].mxu0  ;;  %v319_v20 = vpop.f32.mrb[0].mxu1 }
 0x1a5   :  { %v252_v18 = vadd.f32 %v1404_v16, %v251_v17  ;;  %v1486_v21 = vpop.f32.mrb[1].mxu0  ;;  %v1494_v22 = vpop.f32.mrb[1].mxu1  ;;  %v320_v27 = vadd.f32 %v1408_v19, %v319_v20 }
 0x1a6   :  { %v254_v23 = vpop.f32.mrb[2].mxu0  ;;  %v322_v25 = vpop.f32.mrb[2].mxu1 }
 0x1a7   :  { %v255_v24 = vadd.f32 %v1404_v16, %v254_v23  ;;  %v1487_v26 = vpop.f32.mrb[3].mxu0  ;;  %v323_v28 = vadd.f32 %v1408_v19, %v322_v25  ;;  %v1495_v29 = vpop.f32.mrb[3].mxu1 }
 0x1a9   :  { %v2227_v30 = vpack.c.bf16 %v255_v24, %v252_v18  ;;  %v2229_v31 = vpack.c.bf16 %v323_v28, %v320_v27 }
 0x1ab   :  { %396 = vrot.lane.b32.xlu1 %v2227_v30, %s1966_s10  ;;  %403 = vrot.lane.b32.xlu0 %v2229_v31, %s1966_s10  ;;  %v421_v32 = vsel %vm416_vm2, %v2229_v31, 0 }
 0x1ac   :  { %1505 = vmatpush3.bf16.xpose.msra.mxu1 %v421_v32 }
 0x1ad   :  { %1516 = vmatprep.subr.bf16.mxu1 %v1964_v0  ;;  %v387_v34 = vpop.f32.mrb[4].mxu0 }
 0x1ae   :  { %v388_v35 = vadd.f32 %v1412_v33, %v387_v34  ;;  %v1502_v36 = vpop.f32.mrb[5].mxu0 }
 0x1af   :  { %407 = vrot.lane.b32.xlu1 %v2229_v31, %s1967_s22  ;;  %405 = vrot.lane.b32.xlu0 %v2229_v31, %s1968_s13  ;;  %v390_v37 = vpop.f32.mrb[6].mxu0 }
 0x1b0   :  { %v391_v38 = vadd.f32 %v1412_v33, %v390_v37  ;;  %v1503_v39 = vpop.f32.mrb[7].mxu0 }
 0x1b2   :  { %v2250_v40 = vpack.c.bf16 %v391_v38, %v388_v35 }
 0x1b3   :  { %400 = vrot.lane.b32.xlu1 %v2227_v30, %s1967_s22  ;;  %398 = vrot.lane.b32.xlu0 %v2227_v30, %s1968_s13 }
 0x1b4   :  { %1507 = vmatmul.mubr.msk.bf16.vlgmr.msra.gmra.mrb[4].mxu1 %vm416_vm2, %v2227_v30  ;;  %v654_v48 = vsel %vm652_vm3, %v2250_v40, 0 }
 0x1b5   :  { %1518 = vmatprep.mubr.msk.bf16.mxu1 %vm1965_vm0, %v1964_v0 }
 0x21d   :  { %v2252_v41 = vpop.permute.xlu0 %403  ;;  %v2254_v42 = vpop.permute.xlu1 %396 }
 0x21e   :  { %v467_v43 = vsel %vm416_vm2, %v2252_v41, 0 }
 0x21f   :  { %1511 = vmatpush3.bf16.xpose.msra.mxu0 %v467_v43 }
 0x220   :  { %1522 = vmatprep.subr.bf16.mxu0 %v1964_v0 }
 0x221   :  { %v2259_v44 = vpop.permute.xlu0 %405  ;;  %v2263_v46 = vpop.permute.xlu1 %407 }
 0x222   :  { %v513_v45 = vsel %vm416_vm2, %v2259_v44, 0  ;;  %v559_v47 = vsel %vm416_vm2, %v2263_v46, 0 }
 0x223   :  { %1517 = vmatpush3.bf16.xpose.msra.mxu1 %v513_v45 }
 0x224   :  { %1528 = vmatprep.subr.bf16.mxu1 %v1964_v0 }
 0x225   :  { %v2275_v49 = vpop.permute.xlu0 %398  ;;  %v2282_v50 = vpop.permute.xlu1 %400 }
 0x226   :  { %1513 = vmatmul.mubr.msk.bf16.vlgmr.msra.gmra.mrb[8].mxu0 %vm416_vm2, %v2254_v42 }
 0x227   :  { %1523 = vmatpush3.bf16.xpose.msra.mxu0 %v559_v47  ;;  %1524 = vmatprep.mubr.msk.bf16.mxu0 %vm1965_vm0, %v1964_v0 }
 0x228   :  { %1534 = vmatprep.subr.bf16.mxu0 %v1964_v0 }
 0x22a   :  { %1519 = vmatmul.mubr.msk.bf16.vlgmr.msra.gmra.mrb[8].mxu1 %vm416_vm2, %v2275_v49 }
 0x22b   :  { %1529 = vmatpush3.bf16.msra.mxu1 %v654_v48  ;;  %1530 = vmatprep.mubr.msk.bf16.mxu1 %vm1965_vm0, %v1964_v0 }
 0x22c   :  { %1540 = vmatprep.subr.bf16.mxu1 %v1964_v0 }
 0x22e   :  { %1525 = vmatmul.mubr.msk.bf16.vlgmr.msra.gmra.mrb[12].mxu0 %vm416_vm2, %v2282_v50 }
 0x22f   :  { %1536 = vmatprep.mubr.msk.bf16.mxu0 %vm1965_vm0, %v1964_v0 }
 0x287   :  { %v457_v51 = vpop.f32.mrb[4].mxu1 }
 0x288   :  { %v1508_v52 = vpop.f32.mrb[5].mxu1  ;;  %v601_v53 = vsel %vm416_vm2, %v457_v51, -inf }
 0x289   :  { %602 = vmax.xlane.f32.xlu0 %v601_v53  ;;  %v460_v54 = vpop.f32.mrb[6].mxu1 }
 0x28a   :  { %v1509_v55 = vpop.f32.mrb[7].mxu1 }
 0x2f9   :  { %v503_v56 = vpop.f32.mrb[8].mxu0 }
 0x2fa   :  { %v1514_v57 = vpop.f32.mrb[9].mxu0  ;;  %v604_v58 = vsel %vm416_vm2, %v503_v56, -inf }
 0x2fb   :  { %605 = vmax.xlane.f32.xlu1 %v604_v58  ;;  %v506_v59 = vpop.f32.mrb[10].mxu0 }
 0x2fc   :  { %v1515_v60 = vpop.f32.mrb[11].mxu0  ;;  %v908_v59 = vrot.slane %v2252_v41, 4  ;;  %v859_v41 = vrot.slane %v2227_v30, 4  ;;  %v1099_v30 = vrot.slane %v2250_v40, 4 }
 0x2fd   :  { %v549_v61 = vpop.f32.mrb[8].mxu1 }
 0x2fe   :  { %v1520_v62 = vpop.f32.mrb[9].mxu1  ;;  %v607_v63 = vsel %vm416_vm2, %v549_v61, -inf }
 0x2ff   :  { %608 = vmax.xlane.f32.xlu0 %v607_v63  ;;  %v552_v1 = vpop.f32.mrb[10].mxu1  ;;  %v956_v62 = vrot.slane %v2259_v44, 4  ;;  %v1004_v63 = vrot.slane %v2263_v46, 4 }
 0x300   :  { %v1521_v2 = vpop.f32.mrb[11].mxu1 }
 0x301   :  { %v595_v3 = vpop.f32.mrb[12].mxu0  ;;  %v961_v1 = vsel %vm416_vm2, %v956_v62, 0  ;;  %v907_v2 = vrot.slane %v2254_v42, 4  ;;  %v1009_v44 = vsel %vm416_vm2, %v1004_v63, 0  ;;  %v955_v42 = vrot.slane %v2275_v49, 4 }
 0x302   :  { %v1526_v4 = vpop.f32.mrb[13].mxu0  ;;  %v610_v5 = vsel %vm416_vm2, %v595_v3, -inf }
 0x303   :  { %611 = vmax.xlane.f32.xlu0 %v610_v5  ;;  %v598_v6 = vpop.f32.mrb[14].mxu0  ;;  %v1003_v4 = vrot.slane %v2282_v50, 4 }
 0x304   :  { %v1527_v7 = vpop.f32.mrb[15].mxu0 }
 0x30c   :  { %410 = vrot.lane.b32.xlu1 %v2250_v40, %s1966_s10 }
 0x316   :  { %v603_v8 = vpop.xlane.xlu0 %602 }
 0x317   :  { %v613_v9 = vsub.f32 %v457_v51, %v603_v8 }
 0x319   :  { %v617_v10 = vmul.f32 1.442695, %v613_v9 }
 0x31b   :  { %1639 = vpow2.f32 %v617_v10 }
 0x325   :  { %v1640_v11 = vpop.eup %1639 }
 0x326   :  { %v625_v12 = vsel %vm416_vm2, %v1640_v11, 0.0 }
 0x330   :  { %626 = vadd.xlane.f32.xlu1 %v625_v12 }
 0x388   :  { %v606_v13 = vpop.xlane.xlu1 %605 }
 0x389   :  { %v614_v14 = vsub.f32 %v503_v56, %v606_v13  ;;  %v860_v56 = vrot.slane %v2229_v31, 4  ;;  %v913_v31 = vsel %vm416_vm2, %v908_v59, 0 }
 0x38b   :  { %v619_v15 = vmul.f32 1.442695, %v614_v14  ;;  %v865_v60 = vsel %vm416_vm2, %v860_v56, 0 }
 0x38c   :  { %v609_v16 = vpop.xlane.xlu0 %608  ;;  %v2295_v17 = vpop.permute.xlu1 %410 }
 0x38d   :  { %1641 = vpow2.f32 %v619_v15  ;;  %v615_v18 = vsub.f32 %v549_v61, %v609_v16  ;;  %v700_v19 = vsel %vm652_vm3, %v2295_v17, 0  ;;  %v1146_v46 = vrot.slane %v2295_v17, 4 }
 0x38e   :  { %1535 = vmatpush3.bf16.msra.mxu0 %v700_v19 }
 0x38f   :  { %v621_v20 = vmul.f32 1.442695, %v615_v18  ;;  %1546 = vmatprep.subr.bf16.mxu0 %v1964_v0 }
 0x390   :  { %v612_v21 = vpop.xlane.xlu0 %611 }
 0x391   :  { %1643 = vpow2.f32 %v621_v20  ;;  %v616_v22 = vsub.f32 %v595_v3, %v612_v21  ;;  %v1104_v3 = vsel %vm652_vm3, %v1099_v30, 0 }
 0x393   :  { %v623_v23 = vmul.f32 1.442695, %v616_v22 }
 0x395   :  { %1645 = vpow2.f32 %v623_v23 }
 0x397   :  { %v1642_v24 = vpop.eup %1641 }
 0x398   :  { %v628_v25 = vsel %vm416_vm2, %v1642_v24, 0.0 }
 0x399   :  { %629 = vadd.xlane.f32.xlu0 %v628_v25 }
 0x39b   :  { %v1644_v26 = vpop.eup %1643 }
 0x39c   :  { %v631_v27 = vsel %vm416_vm2, %v1644_v26, 0.0 }
 0x39d   :  { %632 = vadd.xlane.f32.xlu1 %v631_v27 }
 0x39f   :  { %v1646_v28 = vpop.eup %1645 }
 0x3a0   :  { %v634_v29 = vsel %vm416_vm2, %v1646_v28, 0.0 }
 0x3a1   :  { %635 = vadd.xlane.f32.xlu0 %v634_v29 }
 0x3ae   :  { %414 = vrot.lane.b32.xlu1 %v2250_v40, %s1967_s22 }
 0x3b7   :  { %412 = vrot.lane.b32.xlu0 %v2250_v40, %s1968_s13  ;;  %v1151_v40 = vsel %vm652_vm3, %v1146_v46, 0 }
 0x3bd   :  { %v627_v32 = vpop.xlane.xlu1 %626 }
 0x3be   :  { %1647 = vrcp.f32 %v627_v32 }
 0x3c8   :  { %v1648_v33 = vpop.eup %1647 }
 0x3c9   :  { %v641_v34 = vmul.f32 %v1648_v33, %v1640_v11 }
 0x3cb   :  { %v645_v35 = vpack.c.bf16 %v641_v34, %v641_v34 }
 0x3cd   :  { %1531 = vmatmul.mubr.msk.bf16.vlgmr.msra.gmra.mrb[12].mxu1 %vm416_vm2, %v645_v35 }
 0x3ce   :  { %1542 = vmatprep.mubr.msk.bf16.mxu1 %vm1965_vm0, %v1964_v0 }
 0x426   :  { %v630_v36 = vpop.xlane.xlu0 %629 }
 0x427   :  { %1649 = vrcp.f32 %v630_v36 }
 0x42a   :  { %v633_v37 = vpop.xlane.xlu1 %632 }
 0x42b   :  { %1651 = vrcp.f32 %v633_v37 }
 0x42e   :  { %v636_v38 = vpop.xlane.xlu0 %635  ;;  %v2312_v47 = vpop.permute.xlu1 %414 }
 0x42f   :  { %1653 = vrcp.f32 %v636_v38  ;;  %v792_v54 = vsel %vm652_vm3, %v2312_v47, 0 }
 0x431   :  { %v1650_v39 = vpop.eup %1649 }
 0x432   :  { %v642_v43 = vmul.f32 %v1650_v39, %v1642_v24  ;;  %v2310_v45 = vpop.permute.xlu0 %412 }
 0x433   :  { %v746_v48 = vsel %vm652_vm3, %v2310_v45, 0 }
 0x434   :  { %1541 = vmatpush3.bf16.msra.mxu1 %v746_v48  ;;  %v646_v51 = vpack.c.bf16 %v642_v43, %v642_v43 }
 0x435   :  { %v1652_v52 = vpop.eup %1651  ;;  %1552 = vmatprep.subr.bf16.mxu1 %v1964_v0 }
 0x436   :  { %v643_v53 = vmul.f32 %v1652_v52, %v1644_v26  ;;  %1537 = vmatmul.mubr.msk.bf16.vlgmr.msra.gmra.mrb[16].mxu0 %vm416_vm2, %v646_v51 }
 0x437   :  { %1547 = vmatpush3.bf16.msra.mxu0 %v792_v54  ;;  %1548 = vmatprep.mubr.msk.bf16.mxu0 %vm1965_vm0, %v1964_v0 }
 0x438   :  { %v647_v55 = vpack.c.bf16 %v643_v53, %v643_v53  ;;  %1558 = vmatprep.subr.bf16.mxu0 %v1964_v0 }
 0x439   :  { %v1654_v57 = vpop.eup %1653 }
 0x43a   :  { %v644_v58 = vmul.f32 %v1654_v57, %v1646_v28  ;;  %1543 = vmatmul.mubr.msk.bf16.vlgmr.msra.gmra.mrb[16].mxu1 %vm416_vm2, %v647_v55 }
 0x43b   :  { %1554 = vmatprep.mubr.msk.bf16.mxu1 %vm1965_vm0, %v1964_v0 }
 0x43c   :  { %v648_v61 = vpack.c.bf16 %v644_v58, %v644_v58 }
 0x43d   :  { %1553 = vmatpush3.bf16.xpose.msra.mxu1 %v865_v60 }
 0x43e   :  { %1549 = vmatmul.mubr.msk.bf16.vlgmr.msra.gmra.mrb[20].mxu0 %vm416_vm2, %v648_v61  ;;  %1564 = vmatprep.subr.bf16.mxu1 %v1964_v0 }
 0x43f   :  { %1560 = vmatprep.mubr.msk.bf16.mxu0 %vm1965_vm0, %v1964_v0 }
 0x440   :  { %1559 = vmatpush3.bf16.xpose.msra.mxu0 %v913_v31 }
 0x441   :  { %1570 = vmatprep.subr.bf16.mxu0 %v1964_v0 }
 0x444   :  { %1555 = vmatmul.mubr.msk.bf16.vlgmr.msra.gmra.mrb[20].mxu1 %vm416_vm2, %v859_v41 }
 0x445   :  { %1565 = vmatpush3.bf16.xpose.msra.mxu1 %v961_v1  ;;  %1566 = vmatprep.mubr.msk.bf16.mxu1 %vm1965_vm0, %v1964_v0 }
 0x446   :  { %1576 = vmatprep.subr.bf16.mxu1 %v1964_v0 }
 0x447   :  { %1561 = vmatmul.mubr.msk.bf16.vlgmr.msra.gmra.mrb[24].mxu0 %vm416_vm2, %v907_v2 }
 0x448   :  { %1571 = vmatpush3.bf16.xpose.msra.mxu0 %v1009_v44  ;;  %1572 = vmatprep.mubr.msk.bf16.mxu0 %vm1965_vm0, %v1964_v0 }
 0x449   :  { %1582 = vmatprep.subr.bf16.mxu0 %v1964_v0 }
 0x44c   :  { %1567 = vmatmul.mubr.msk.bf16.vlgmr.msra.gmra.mrb[24].mxu1 %vm416_vm2, %v955_v42 }
 0x44d   :  { %1577 = vmatpush3.bf16.msra.mxu1 %v1104_v3  ;;  %1578 = vmatprep.mubr.msk.bf16.mxu1 %vm1965_vm0, %v1964_v0 }
 0x44e   :  { %1588 = vmatprep.subr.bf16.mxu1 %v1964_v0 }
 0x44f   :  { %1573 = vmatmul.mubr.msk.bf16.vlgmr.msra.gmra.mrb[28].mxu0 %vm416_vm2, %v1003_v4 }
 0x450   :  { %1583 = vmatpush3.bf16.msra.mxu0 %v1151_v40  ;;  %1584 = vmatprep.mubr.msk.bf16.mxu0 %vm1965_vm0, %v1964_v0 }
 0x451   :  { %1594 = vmatprep.subr.bf16.mxu0 %v1964_v0 }
 0x4a0   :  { %v2363_v49 = vpop.f32.mrb[12].mxu1 }
 0x4a1   :  { %v1532_v5 = vpop.f32.mrb[13].mxu1 }
 0x4a2   :  { %v693_v50 = vpop.f32.mrb[14].mxu1 }
 0x4a3   :  { %v1533_v6 = vpop.f32.mrb[15].mxu1  ;;  %v1193_v50 = vrot.slane %v2310_v45, 4 }
 0x509   :  { %v2365_v7 = vpop.f32.mrb[16].mxu0 }
 0x50a   :  { %v1538_v8 = vpop.f32.mrb[17].mxu0  ;;  %v835_v42 = vpack.c.bf16 %v2365_v7, %v2365_v7  ;;  %v1198_v7 = vsel %vm652_vm3, %v1193_v50, 0 }
 0x50b   :  { %v739_v9 = vpop.f32.mrb[18].mxu0 }
 0x50c   :  { %v1539_v10 = vpop.f32.mrb[19].mxu0 }
 0x50d   :  { %v2367_v11 = vpop.f32.mrb[16].mxu1  ;;  %v1240_v10 = vrot.slane %v2312_v47, 4 }
 0x50e   :  { %v1544_v12 = vpop.f32.mrb[17].mxu1 }
 0x50f   :  { %v785_v13 = vpop.f32.mrb[18].mxu1  ;;  %v1245_v45 = vsel %vm652_vm3, %v1240_v10, 0 }
 0x510   :  { %v1545_v14 = vpop.f32.mrb[19].mxu1 }
 0x511   :  { %v2369_v15 = vpop.f32.mrb[20].mxu0 }
 0x512   :  { %v1550_v16 = vpop.f32.mrb[21].mxu0 }
 0x513   :  { %v831_v17 = vpop.f32.mrb[22].mxu0 }
 0x514   :  { %v1551_v18 = vpop.f32.mrb[23].mxu0 }
 0x517   :  { %v901_v19 = vpop.f32.mrb[20].mxu1 }
 0x518   :  { %v1556_v20 = vpop.f32.mrb[21].mxu1  ;;  %v1051_v21 = vsel %vm416_vm2, %v901_v19, -inf }
 0x519   :  { %1052 = vmax.xlane.f32.xlu1 %v1051_v21  ;;  %v904_v22 = vpop.f32.mrb[22].mxu1 }
 0x51a   :  { %v949_v23 = vpop.f32.mrb[24].mxu0  ;;  %v1557_v24 = vpop.f32.mrb[23].mxu1 }
 0x51b   :  { %v1562_v25 = vpop.f32.mrb[25].mxu0  ;;  %v1054_v26 = vsel %vm416_vm2, %v949_v23, -inf }
 0x51c   :  { %1055 = vmax.xlane.f32.xlu0 %v1054_v26  ;;  %v952_v27 = vpop.f32.mrb[26].mxu0 }
 0x51d   :  { %v1563_v28 = vpop.f32.mrb[27].mxu0 }
 0x51f   :  { %v997_v29 = vpop.f32.mrb[24].mxu1 }
 0x520   :  { %v1568_v32 = vpop.f32.mrb[25].mxu1  ;;  %v1057_v33 = vsel %vm416_vm2, %v997_v29, -inf }
 0x521   :  { %v1000_v34 = vpop.f32.mrb[26].mxu1  ;;  %1058 = vmax.xlane.f32.xlu0 %v1057_v33  ;;  %v1638_v33 = vld [vmem:[#allocation18 + $0x8] sm:$0xff]  }
 0x522   :  { %v1045_v35 = vpop.f32.mrb[28].mxu0  ;;  %v1569_v36 = vpop.f32.mrb[27].mxu1 }
 0x523   :  { %v1574_v37 = vpop.f32.mrb[29].mxu0  ;;  %v1060_v38 = vsel %vm416_vm2, %v1045_v35, -inf }
 0x524   :  { %1061 = vmax.xlane.f32.xlu1 %v1060_v38  ;;  %v1048_v39 = vpop.f32.mrb[30].mxu0 }
 0x525   :  { %v1575_v43 = vpop.f32.mrb[31].mxu0 }
 0x5a6   :  { %v1053_v48 = vpop.xlane.xlu1 %1052 }
 0x5a7   :  { %v1063_v51 = vsub.f32 %v901_v19, %v1053_v48  ;;  %v836_v48 = vpack.c.bf16 %v2367_v11, %v2367_v11  ;;  %v834_v11 = vpack.c.bf16 %v2363_v49, %v2363_v49 }
 0x5a9   :  { %v1067_v52 = vmul.f32 1.442695, %v1063_v51  ;;  %v1056_v53 = vpop.xlane.xlu0 %1055 }
 0x5aa   :  { %v1064_v54 = vsub.f32 %v949_v23, %v1056_v53  ;;  %v837_v53 = vpack.c.bf16 %v2369_v15, %v2369_v15 }
 0x5ab   :  { %1655 = vpow2.f32 %v1067_v52 }
 0x5ac   :  { %v1069_v55 = vmul.f32 1.442695, %v1064_v54 }
 0x5ae   :  { %1657 = vpow2.f32 %v1069_v55  ;;  %v1059_v56 = vpop.xlane.xlu0 %1058 }
 0x5af   :  { %v1065_v57 = vsub.f32 %v997_v29, %v1059_v56  ;;  %v1637_v29 = vld [vmem:[#allocation18] sm:$0xff]  }
 0x5b1   :  { %v1071_v58 = vmul.f32 1.442695, %v1065_v57  ;;  %v1062_v59 = vpop.xlane.xlu1 %1061 }
 0x5b2   :  { %v1066_v60 = vsub.f32 %v1045_v35, %v1062_v59 }
 0x5b3   :  { %1659 = vpow2.f32 %v1071_v58 }
 0x5b4   :  { %v1073_v61 = vmul.f32 1.442695, %v1066_v60 }
 0x5b5   :  { %v1656_v31 = vpop.eup %1655 }
 0x5b6   :  { %1661 = vpow2.f32 %v1073_v61  ;;  %v1075_v62 = vsel %vm416_vm2, %v1656_v31, 0.0 }
 0x5b7   :  { %1076 = vadd.xlane.f32.xlu0 %v1075_v62 }
 0x5b8   :  { %v1658_v41 = vpop.eup %1657 }
 0x5b9   :  { %v1078_v63 = vsel %vm416_vm2, %v1658_v41, 0.0 }
 0x5ba   :  { %1079 = vadd.xlane.f32.xlu1 %v1078_v63 }
 0x5bd   :  { %v1660_v1 = vpop.eup %1659 }
 0x5be   :  { %v1081_v2 = vsel %vm416_vm2, %v1660_v1, 0.0 }
 0x5bf   :  { %1082 = vadd.xlane.f32.xlu0 %v1081_v2  ;;  %v1432_v2 = vld [vmem:[#allocation20] ss:$0 sm:$0xff] }
 0x5c0   :  { %v1662_v44 = vpop.eup %1661 }
 0x5c1   :  { %v1084_v30 = vsel %vm416_vm2, %v1662_v44, 0.0 }
 0x5c2   :  { %1085 = vadd.xlane.f32.xlu1 %v1084_v30 }
 0x5d3   :  { %839 = vrot.lane.b32.xlu1 %v835_v42, %s1952_s30 }
 0x644   :  { %v1077_v46 = vpop.xlane.xlu0 %1076 }
 0x645   :  { %1663 = vrcp.f32 %v1077_v46 }
 0x647   :  { %v1080_v3 = vpop.xlane.xlu1 %1079 }
 0x648   :  { %1665 = vrcp.f32 %v1080_v3 }
 0x64c   :  { %v1083_v4 = vpop.xlane.xlu0 %1082 }
 0x64d   :  { %1667 = vrcp.f32 %v1083_v4 }
 0x64f   :  { %v1664_v40 = vpop.eup %1663  ;;  %v1086_v5 = vpop.xlane.xlu1 %1085 }
 0x650   :  { %v1091_v6 = vmul.f32 %v1664_v40, %v1656_v31  ;;  %1669 = vrcp.f32 %v1086_v5 }
 0x652   :  { %v1666_v8 = vpop.eup %1665  ;;  %v1095_v9 = vpack.c.bf16 %v1091_v6, %v1091_v6 }
 0x653   :  { %v1092_v12 = vmul.f32 %v1666_v8, %v1658_v41 }
 0x654   :  { %1579 = vmatmul.mubr.msk.bf16.vlgmr.msra.gmra.mrb[28].mxu1 %vm416_vm2, %v1095_v9 }
 0x655   :  { %1589 = vmatpush3.bf16.msra.mxu1 %v1198_v7  ;;  %v1096_v13 = vpack.c.bf16 %v1092_v12, %v1092_v12  ;;  %1590 = vmatprep.mubr.msk.bf16.mxu1 %vm1965_vm0, %v1964_v0 }
 0x656   :  { %1600 = vmatprep.subr.bf16.mxu1 %v1964_v0 }
 0x657   :  { %v1668_v14 = vpop.eup %1667  ;;  %1585 = vmatmul.mubr.msk.bf16.vlgmr.msra.gmra.mrb[32].mxu0 %vm416_vm2, %v1096_v13 }
 0x658   :  { %v1093_v16 = vmul.f32 %v1668_v14, %v1660_v1  ;;  %1595 = vmatpush3.bf16.msra.mxu0 %v1245_v45  ;;  %1596 = vmatprep.mubr.msk.bf16.mxu0 %vm1965_vm0, %v1964_v0 }
 0x65a   :  { %v1670_v47 = vpop.eup %1669  ;;  %v1097_v17 = vpack.c.bf16 %v1093_v16, %v1093_v16 }
 0x65b   :  { %v1094_v18 = vmul.f32 %v1670_v47, %v1662_v44 }
 0x65c   :  { %1591 = vmatmul.mubr.msk.bf16.vlgmr.msra.gmra.mrb[32].mxu1 %vm416_vm2, %v1097_v17 }
 0x65d   :  { %v1098_v19 = vpack.c.bf16 %v1094_v18, %v1094_v18  ;;  %1604 = vmatprep.mubr.msk.bf16.mxu1 %vm1965_vm0, %v1964_v0  ;;  %1601 = vmatpush3.bf16.msra.mxu1 %v1637_v29 }
 0x65e   :  { %1602 = vmatprep.subr.bf16.mxu1 %v1964_v0  ;;  %v840_v0 = vpop.permute.xlu1 %839 }
 0x65f   :  { %1597 = vmatmul.mubr.msk.bf16.vlgmr.msra.gmra.mrb[36].mxu0 %vm416_vm2, %v1098_v19  ;;  %v849_v60 = vsel %vm416_vm2, %v834_v11, %v840_v0 }
 0x661   :  { %1603 = vmatpush3.bf16.msra.mxu1 %v1638_v33 }
 0x727   :  { %v1140_v20 = vpop.f32.mrb[28].mxu1 }
 0x728   :  { %v1580_v21 = vpop.f32.mrb[29].mxu1  ;;  %v1287_v55 = vpack.c.bf16 %v1140_v20, %v1140_v20 }
 0x729   :  { %v1143_v22 = vpop.f32.mrb[30].mxu1 }
 0x72a   :  { %v1187_v23 = vpop.f32.mrb[32].mxu0  ;;  %v1581_v24 = vpop.f32.mrb[31].mxu1 }
 0x72b   :  { %v1288_v25 = vpack.c.bf16 %v1187_v23, %v1187_v23  ;;  %v1586_v26 = vpop.f32.mrb[33].mxu0 }
 0x72c   :  { %v1190_v27 = vpop.f32.mrb[34].mxu0 }
 0x72d   :  { %1292 = vrot.lane.b32.xlu0 %v1288_v25, %s1952_s30  ;;  %v1587_v28 = vpop.f32.mrb[35].mxu0 }
 0x72f   :  { %v1234_v32 = vpop.f32.mrb[32].mxu1 }
 0x730   :  { %v1289_v34 = vpack.c.bf16 %v1234_v32, %v1234_v32  ;;  %v1592_v35 = vpop.f32.mrb[33].mxu1 }
 0x731   :  { %v1237_v36 = vpop.f32.mrb[34].mxu1 }
 0x732   :  { %v1281_v37 = vpop.f32.mrb[36].mxu0  ;;  %v1593_v38 = vpop.f32.mrb[35].mxu1  ;;  %1295 = vrot.lane.b32.xlu1 %v1289_v34, %s1969_s14 }
 0x733   :  { %v1290_v39 = vpack.c.bf16 %v1281_v37, %v1281_v37  ;;  %v1598_v43 = vpop.f32.mrb[37].mxu0 }
 0x734   :  { %v1284_v51 = vpop.f32.mrb[38].mxu0 }
 0x735   :  { %1298 = vrot.lane.b32.xlu0 %v1290_v39, %s1970_s15  ;;  %v1599_v52 = vpop.f32.mrb[39].mxu0 }
 0x736   :  { %842 = vrot.lane.b32.xlu1 %v836_v48, %s1969_s14 }
 0x739   :  { %845 = vrot.lane.b32.xlu0 %v837_v53, %s1970_s15 }
 0x79f   :  { %v1293_v54 = vpop.permute.xlu0 %1292 }
 0x7a0   :  { %v1302_v56 = vsel %vm416_vm2, %v1287_v55, %v1293_v54 }
 0x7a4   :  { %v1296_v57 = vpop.permute.xlu1 %1295 }
 0x7a5   :  { %v1304_v58 = vsel %vm850_vm4, %v1302_v56, %v1296_v57 }
 0x7a7   :  { %v1299_v59 = vpop.permute.xlu0 %1298 }
 0x7a8   :  { %v1306_v61 = vsel %vm853_vm5, %v1304_v58, %v1299_v59  ;;  %v843_v31 = vpop.permute.xlu1 %842 }
 0x7a9   :  { %v1308_v15 = vrot.slane %v1306_v61, 4  ;;  %v852_v62 = vsel %vm850_vm4, %v849_v60, %v843_v31 }
 0x7ab   :  { %1311 = vst.msk [vmem:[#allocation2] sm:$0xf0] %vm1310_vm6, %v1308_v15  ;;  %v846_v41 = vpop.permute.xlu0 %845 }
 0x7ac   :  { %v855_v63 = vsel %vm853_vm5, %v852_v62, %v846_v41 }
 0x7ad   :  { %858 = vst.msk [vmem:[#allocation2] sm:$0xf] %vm857_vm7, %v855_v63 }
 0x7b4   :  { %v1312_v1 = vld [vmem:[#allocation2] sm:$0xff] }
 0x7b5   :  { %1605 = vmatmul.mubr.msk.bf16.vlgmr.msra.gmra.mrb[36].mxu1 %vm213_vm1, %v1312_v1 }
 0x888   :  { %v1373_v44 = vpop.f32.mrb[36].mxu1 }
 0x889   :  { %v1374_v49 = vadd.f32 %v1432_v2, %v1373_v44  ;;  %v1606_v30 = vpop.f32.mrb[37].mxu1 }
 0x88a   :  { %v1376_v42 = vpop.f32.mrb[38].mxu1 }
 0x88b   :  { %1380 = vst.msk [vmem:[#allocation21] sm:$0xff] %vm213_vm1, %v1374_v49  ;;  %v1377_v46 = vadd.f32 %v1432_v2, %v1376_v42  ;;  %v1607_v3 = vpop.f32.mrb[39].mxu1 }
 0x88d   :  { %1381 = vst.msk [vmem:[#allocation21 + $0x8] sm:$0xff] %vm213_vm1, %v1377_v46 }
 0x88e   :  { %1924 = shalt.err (!%p1921_p8)
}
 0x88f   :  { %s1925_s9 = scalar_lea.hbm %s2436_s11, 256 }
 0x890   :  { %p1926_p9 = scmp.ne.s32.totalorder %s2436_s11, %s1925_s9  ;;  %p1929_p10 = scmp.lt.u32.totalorder %s1925_s9, %s2436_s11 }
 0x892   :  { %p1931_p11 = pnand %p1929_p10, %p1926_p9 }
 0x894   :  { %1934 = shalt.err (!%p1931_p11)
}
 0x895   :  { %1393 = dma.vmem_to_hbm [thread:$0]  %s1388_s27, 256, %s2436_s11, [#allocation5], %s1951_s29, %s1951_s29, %s1952_s30  }
 0x896   :  { %1947 = dma.done.wait [#allocation5], 256  }
 0x897   :  { %1948 = vsyncadd [#allocation5], 4294967040 }
 0x898   :  { %1397 = vsyncpa [#allocation4], 1 }
 0x899   :  { %1398 = vsyncpa [#allocation7], 1 }
 0x89a   :  { %1399 = vsyncpa [#allocation10], 1 }
 0x89b   :  { %1400 = vsyncpa [#allocation13], 1 }
 0x89c   :  { %1401 = vsyncpa [#allocation16], 1 }
 0x89d   :  { %1402 = vsyncpa [#allocation19], 1 }
 0x89e   :  { %1403 = vsyncpa [#allocation5], 1 }

</bundles_post_ra>
